<compile_context>
chip_gen: v5e
topology: v5e:2x2
jax: 0.10.0
libtpu: 0.0.40
codegen_flags: <defaults>
</compile_context>

<pallas_src>
import math

import jax
import jax.numpy as jnp
from jax.experimental import pallas as pl
from jax.experimental.pallas import tpu as pltpu


# ---------------------------------------------------------------------------
# Fused GEGLU kernel:  out = (x @ Wa + ba) * gelu(x @ Wg + bg)
# ---------------------------------------------------------------------------
def _geglu_fused_kernel(x_ref, wa_ref, wg_ref, ba_ref, bg_ref, o_ref, acc_a, acc_g):
    k = pl.program_id(2)

    @pl.when(k == 0)
    def _init():
        # Fold the bias into the accumulator init (saves two (tm, tn) VALU adds and
        # the sublane-broadcast in the epilogue).
        acc_a[...] = jnp.broadcast_to(ba_ref[...].astype(jnp.float32), acc_a.shape)
        acc_g[...] = jnp.broadcast_to(bg_ref[...].astype(jnp.float32), acc_g.shape)

    x = x_ref[...]
    acc_a[...] += jnp.dot(x, wa_ref[...], preferred_element_type=jnp.float32)
    acc_g[...] += jnp.dot(x, wg_ref[...], preferred_element_type=jnp.float32)

    @pl.when(k == pl.num_programs(2) - 1)
    def _epilogue():
        a = acc_a[...]
        g = acc_g[...]
        # exact (erf-based) GELU, matching torch.nn.functional.gelu default
        gelu_g = 0.5 * g * (1.0 + jax.lax.erf(g * 0.7071067811865476))
        o_ref[...] = (a * gelu_g).astype(o_ref.dtype)


def _round_up(x, m):
    return ((x + m - 1) // m) * m


def _pick_tile(dim, target, align):
    """Largest tile <= target that is a multiple of `align` and divides `dim`,
    falling back to the full dim (always a legal BlockSpec)."""
    if dim <= target or dim % align != 0:
        return dim
    t = (min(target, dim) // align) * align
    while t >= align:
        if dim % t == 0:
            return t
        t -= align
    return dim


def geglu_pallas(x, w, b, *, tm=None, tn=None, tk=None):
    """GEGLU forward.

    x: (..., dim_in)
    w: (dim_in, 2*dim_out)   (torch weight (2*dim_out, dim_in) pre-transposed)
    b: (2*dim_out,)
    returns (..., dim_out)
    """
    lead = x.shape[:-1]
    K = x.shape[-1]
    two_n = w.shape[-1]
    N = two_n // 2
    M = math.prod(lead) if lead else 1
    x2d = x.reshape(M, K)

    # ---- tile selection ------------------------------------------------------
    # Row tile: multiple of 8; pad M up so the grid divides evenly (robust for odd B*S,
    # and avoids giant single-block fallback tiles blowing VMEM).
    if tm is None:
        tm = min(512, _round_up(M, 8))
    m_pad = _round_up(M, tm)
    if m_pad != M:
        x2d = jnp.pad(x2d, ((0, m_pad - M), (0, 0)))

    # K tile: multiple of 128 dividing K (full-K fallback is a legal block).
    if tk is None:
        tk = _pick_tile(K, 512, 128)

    # N tile: multiple of 128 dividing N.  If the row axis has a single block, cap tn
    # so there are >= 2 parallel column blocks (v7x megacore occupancy).
    if tn is None:
        target_n = 512
        if (m_pad // tm) < 2 and N >= 256 and N % 128 == 0:
            target_n = min(target_n, max(128, (N // 2 // 128) * 128))
        tn = _pick_tile(N, target_n, 128)

    assert m_pad % tm == 0 and N % tn == 0 and K % tk == 0, (tm, tn, tk)

    grid = (m_pad // tm, N // tn, K // tk)
    b2d = b.reshape(1, two_n)

    if N % 128 == 0 and tn % 128 == 0:
        # Fast path: do NOT slice W in the wrapper (that copies the whole weight
        # through HBM every call).  Pass the unsplit (K, 2N) array twice and let the
        # gate BlockSpec add a column-block offset of N // tn.
        ncb = N // tn
        operands = (x2d, w, w, b2d, b2d)
        w_a_spec = pl.BlockSpec((tk, tn), lambda i, j, k: (k, j))
        w_g_spec = pl.BlockSpec((tk, tn), lambda i, j, k: (k, j + ncb))
        b_a_spec = pl.BlockSpec((1, tn), lambda i, j, k: (0, j))
        b_g_spec = pl.BlockSpec((1, tn), lambda i, j, k: (0, j + ncb))
    else:
        # Fallback for non-128-multiple dim_out: split halves in the wrapper (copies W
        # once).  Only taken for irregular shapes; tn == N so blocks equal full halves.
        operands = (x2d, w[:, :N], w[:, N:], b2d[:, :N], b2d[:, N:])
        w_a_spec = pl.BlockSpec((tk, tn), lambda i, j, k: (k, j))
        w_g_spec = pl.BlockSpec((tk, tn), lambda i, j, k: (k, j))
        b_a_spec = pl.BlockSpec((1, tn), lambda i, j, k: (0, j))
        b_g_spec = pl.BlockSpec((1, tn), lambda i, j, k: (0, j))

    itemsize = jnp.dtype(x.dtype).itemsize
    cost = pl.CostEstimate(
        flops=2 * M * K * two_n,
        transcendentals=M * N,
        bytes_accessed=(M * K + K * two_n + two_n + M * N) * itemsize,
    )

    out2d = pl.pallas_call(
        _geglu_fused_kernel,
        out_shape=jax.ShapeDtypeStruct((m_pad, N), x.dtype),
        grid_spec=pltpu.PrefetchScalarGridSpec(
            num_scalar_prefetch=0,
            grid=grid,
            in_specs=[
                pl.BlockSpec((tm, tk), lambda i, j, k: (i, k)),   # x
                w_a_spec,                                         # W  ('a' half view)
                w_g_spec,                                         # W  ('gate' half view)
                b_a_spec,                                         # b  ('a' half view)
                b_g_spec,                                         # b  ('gate' half view)
            ],
            out_specs=pl.BlockSpec((tm, tn), lambda i, j, k: (i, j)),
            scratch_shapes=[
                pltpu.VMEM((tm, tn), jnp.float32),   # acc for 'a'
                pltpu.VMEM((tm, tn), jnp.float32),   # acc for 'gate'
            ],
        ),
        compiler_params=pltpu.CompilerParams(
            # row/col axes shardable across TensorCores; K is the sequential reduction
            dimension_semantics=("parallel", "parallel", "arbitrary"),
            # ~10 MiB working set at default tiles; 48 MiB keeps headroom even on
            # v7x's 64 MiB physical VMEM while covering larger tiles on v5e/v6e.
            vmem_limit_bytes=48 * 1024 * 1024,
        ),
        cost_estimate=cost,
    )(*operands)

    out2d = out2d[:M] if m_pad != M else out2d
    return out2d.reshape(*lead, N)


# ---------------------------------------------------------------------------
# Pure-JAX reference (matches torch: Linear -> chunk -> x * F.gelu(gate))
# ---------------------------------------------------------------------------
def reference_geglu(x, w, b):
    h = x @ w + b
    n = w.shape[-1] // 2
    a, g = h[..., :n], h[..., n:]
    return a * (0.5 * g * (1.0 + jax.lax.erf(g / jnp.sqrt(2.0))))


if __name__ == "__main__":
    # Small shapes consistent with the module: x (batch, seq, dim_in), GEGLU(dim_in, dim_out)
    B, S = 2, 64
    dim_in, dim_out = 256, 256

    key = jax.random.PRNGKey(0)
    kx, kw, kb = jax.random.split(key, 3)
    x = jax.random.normal(kx, (B, S, dim_in), jnp.float32)
    w = jax.random.normal(kw, (dim_in, 2 * dim_out), jnp.float32) * 0.02
    b = jax.random.normal(kb, (2 * dim_out,), jnp.float32) * 0.02

    ref = reference_geglu(x, w, b)

    # Small explicit tiles so the full (i, j, k) grid, the K-accumulation path, and the
    # gate column-block offset are all exercised even at toy shapes: grid = (2, 2, 2).
    out = geglu_pallas(x, w, b, tm=64, tn=128, tk=128)
    out = jax.block_until_ready(out)
    assert out.shape == (B, S, dim_out)
    assert jnp.allclose(out, ref, atol=1e-4, rtol=1e-4), float(jnp.max(jnp.abs(out - ref)))

    # Also exercise the default auto-tiled path (single K step, megacore tn cap).
    out2 = jax.block_until_ready(geglu_pallas(x, w, b))
    assert jnp.allclose(out2, ref, atol=1e-4, rtol=1e-4), float(jnp.max(jnp.abs(out2 - ref)))

    print("KERNEL_OK")
</pallas_src>

<mosaic_0001>
module attributes {stable_mosaic.version = 11 : i64} {
  func.func @_geglu_fused_kernel(%arg0: i32, %arg1: i32, %arg2: i32, %arg3: memref<64x128xf32, #tpu.memory_space<vmem>>, %arg4: memref<128x128xf32, #tpu.memory_space<vmem>>, %arg5: memref<128x128xf32, #tpu.memory_space<vmem>>, %arg6: memref<1x128xf32, #tpu.memory_space<vmem>>, %arg7: memref<1x128xf32, #tpu.memory_space<vmem>>, %arg8: memref<64x128xf32, #tpu.memory_space<vmem>>, %arg9: memref<64x128xf32, #tpu.memory_space<vmem>>, %arg10: memref<64x128xf32, #tpu.memory_space<vmem>>) attributes {dimension_semantics = [#tpu.dimension_semantics<parallel>, #tpu.dimension_semantics<parallel>, #tpu.dimension_semantics<arbitrary>], iteration_bounds = array<i64: 2, 2, 2>, scalar_prefetch = 0 : i64, scratch_operands = 2 : i64, tpu.core_type = #tpu.core_type<tc>, window_params = [{transform_indices = @transform_0, window_bounds = array<i64: 64, 128>}, {transform_indices = @transform_1, window_bounds = array<i64: 128, 128>}, {transform_indices = @transform_2, window_bounds = array<i64: 128, 128>}, {transform_indices = @transform_3, window_bounds = array<i64: 1, 128>}, {transform_indices = @transform_4, window_bounds = array<i64: 1, 128>}, {transform_indices = @transform_5, window_bounds = array<i64: 64, 128>}]} {
    %c0_i32 = arith.constant 0 : i32
    %0 = arith.cmpi eq, %arg2, %c0_i32 : i32
    %1 = arith.extui %0 : i1 to i32
    %c0_i32_0 = arith.constant 0 : i32
    %2 = arith.cmpi ne, %1, %c0_i32_0 : i32
    scf.if %2 {
      %c0_16 = arith.constant 0 : index
      %c0_17 = arith.constant 0 : index
      %17 = vector.load %arg6[%c0_16, %c0_17] : memref<1x128xf32, #tpu.memory_space<vmem>>, vector<1x128xf32>
      %18 = vector.shape_cast %17 : vector<1x128xf32> to vector<1x128xf32>
      %19 = vector.broadcast %18 : vector<1x128xf32> to vector<64x128xf32>
      %c0_18 = arith.constant 0 : index
      %c0_19 = arith.constant 0 : index
      %20 = vector.load %arg9[%c0_18, %c0_19] : memref<64x128xf32, #tpu.memory_space<vmem>>, vector<64x128xf32>
      tpu.vector_store %arg9[%c0_18, %c0_19], %19 {strides = array<i32>} : memref<64x128xf32, #tpu.memory_space<vmem>>, vector<64x128xf32>,
      %c0_20 = arith.constant 0 : index
      %c0_21 = arith.constant 0 : index
      %21 = vector.load %arg7[%c0_20, %c0_21] : memref<1x128xf32, #tpu.memory_space<vmem>>, vector<1x128xf32>
      %22 = vector.shape_cast %21 : vector<1x128xf32> to vector<1x128xf32>
      %23 = vector.broadcast %22 : vector<1x128xf32> to vector<64x128xf32>
      %c0_22 = arith.constant 0 : index
      %c0_23 = arith.constant 0 : index
      %24 = vector.load %arg10[%c0_22, %c0_23] : memref<64x128xf32, #tpu.memory_space<vmem>>, vector<64x128xf32>
      tpu.vector_store %arg10[%c0_22, %c0_23], %23 {strides = array<i32>} : memref<64x128xf32, #tpu.memory_space<vmem>>, vector<64x128xf32>,
    } else {
    }
    %c0 = arith.constant 0 : index
    %c0_1 = arith.constant 0 : index
    %3 = vector.load %arg3[%c0, %c0_1] : memref<64x128xf32, #tpu.memory_space<vmem>>, vector<64x128xf32>
    %c0_2 = arith.constant 0 : index
    %c0_3 = arith.constant 0 : index
    %4 = vector.load %arg9[%c0_2, %c0_3] : memref<64x128xf32, #tpu.memory_space<vmem>>, vector<64x128xf32>
    %c0_4 = arith.constant 0 : index
    %c0_5 = arith.constant 0 : index
    %5 = vector.load %arg4[%c0_4, %c0_5] : memref<128x128xf32, #tpu.memory_space<vmem>>, vector<128x128xf32>
    %cst = arith.constant dense<0.000000e+00> : vector<64x128xf32>
    %6 = tpu.matmul %3, %5, %cst {dimension_numbers = #tpu.dot_dimension_numbers<[1], [0], [0], [1], [0, 0, 1, 1], [], []>} : vector<64x128xf32>, vector<128x128xf32>, vector<64x128xf32> -> vector<64x128xf32>
    %7 = arith.addf %4, %6 : vector<64x128xf32>
    %c0_6 = arith.constant 0 : index
    %c0_7 = arith.constant 0 : index
    %8 = vector.load %arg9[%c0_6, %c0_7] : memref<64x128xf32, #tpu.memory_space<vmem>>, vector<64x128xf32>
    tpu.vector_store %arg9[%c0_6, %c0_7], %7 {strides = array<i32>} : memref<64x128xf32, #tpu.memory_space<vmem>>, vector<64x128xf32>,
    %c0_8 = arith.constant 0 : index
    %c0_9 = arith.constant 0 : index
    %9 = vector.load %arg10[%c0_8, %c0_9] : memref<64x128xf32, #tpu.memory_space<vmem>>, vector<64x128xf32>
    %c0_10 = arith.constant 0 : index
    %c0_11 = arith.constant 0 : index
    %10 = vector.load %arg5[%c0_10, %c0_11] : memref<128x128xf32, #tpu.memory_space<vmem>>, vector<128x128xf32>
    %cst_12 = arith.constant dense<0.000000e+00> : vector<64x128xf32>
    %11 = tpu.matmul %3, %10, %cst_12 {dimension_numbers = #tpu.dot_dimension_numbers<[1], [0], [0], [1], [0, 0, 1, 1], [], []>} : vector<64x128xf32>, vector<128x128xf32>, vector<64x128xf32> -> vector<64x128xf32>
    %12 = arith.addf %9, %11 : vector<64x128xf32>
    %c0_13 = arith.constant 0 : index
    %c0_14 = arith.constant 0 : index
    %13 = vector.load %arg10[%c0_13, %c0_14] : memref<64x128xf32, #tpu.memory_space<vmem>>, vector<64x128xf32>
    tpu.vector_store %arg10[%c0_13, %c0_14], %12 {strides = array<i32>} : memref<64x128xf32, #tpu.memory_space<vmem>>, vector<64x128xf32>,
    %c1_i32 = arith.constant 1 : i32
    %14 = arith.cmpi eq, %arg2, %c1_i32 : i32
    %15 = arith.extui %14 : i1 to i32
    %c0_i32_15 = arith.constant 0 : i32
    %16 = arith.cmpi ne, %15, %c0_i32_15 : i32
    scf.if %16 {
      %c0_16 = arith.constant 0 : index
      %c0_17 = arith.constant 0 : index
      %17 = vector.load %arg9[%c0_16, %c0_17] : memref<64x128xf32, #tpu.memory_space<vmem>>, vector<64x128xf32>
      %c0_18 = arith.constant 0 : index
      %c0_19 = arith.constant 0 : index
      %18 = vector.load %arg10[%c0_18, %c0_19] : memref<64x128xf32, #tpu.memory_space<vmem>>, vector<64x128xf32>
      %cst_20 = arith.constant 5.000000e-01 : f32
      %19 = vector.broadcast %cst_20 : f32 to vector<64x128xf32>
      %20 = arith.mulf %19, %18 : vector<64x128xf32>
      %cst_21 = arith.constant 0.707106769 : f32
      %21 = vector.broadcast %cst_21 : f32 to vector<64x128xf32>
      %22 = arith.mulf %18, %21 : vector<64x128xf32>
      %23 = math.erf %22 : vector<64x128xf32>
      %cst_22 = arith.constant 1.000000e+00 : f32
      %24 = vector.broadcast %cst_22 : f32 to vector<64x128xf32>
      %25 = arith.addf %24, %23 : vector<64x128xf32>
      %26 = arith.mulf %20, %25 : vector<64x128xf32>
      %27 = arith.mulf %17, %26 : vector<64x128xf32>
      %c0_23 = arith.constant 0 : index
      %c0_24 = arith.constant 0 : index
      %28 = vector.load %arg8[%c0_23, %c0_24] : memref<64x128xf32, #tpu.memory_space<vmem>>, vector<64x128xf32>
      tpu.vector_store %arg8[%c0_23, %c0_24], %27 {strides = array<i32>} : memref<64x128xf32, #tpu.memory_space<vmem>>, vector<64x128xf32>,
    } else {
    }
    return
  }
  func.func @transform_0(%arg0: i32, %arg1: i32, %arg2: i32) -> (i32, i32) {
    %c0_i32 = arith.constant 0 : i32
    return %arg0, %arg2 : i32, i32
  }
  func.func @transform_1(%arg0: i32, %arg1: i32, %arg2: i32) -> (i32, i32) {
    %c0_i32 = arith.constant 0 : i32
    return %arg2, %arg1 : i32, i32
  }
  func.func @transform_2(%arg0: i32, %arg1: i32, %arg2: i32) -> (i32, i32) {
    %c2_i32 = arith.constant 2 : i32
    %0 = arith.addi %arg1, %c2_i32 : i32
    %c0_i32 = arith.constant 0 : i32
    return %arg2, %0 : i32, i32
  }
  func.func @transform_3(%arg0: i32, %arg1: i32, %arg2: i32) -> (i32, i32) {
    %c0_i32 = arith.constant 0 : i32
    %c0_i32_0 = arith.constant 0 : i32
    return %c0_i32, %arg1 : i32, i32
  }
  func.func @transform_4(%arg0: i32, %arg1: i32, %arg2: i32) -> (i32, i32) {
    %c2_i32 = arith.constant 2 : i32
    %0 = arith.addi %arg1, %c2_i32 : i32
    %c0_i32 = arith.constant 0 : i32
    %c0_i32_0 = arith.constant 0 : i32
    return %c0_i32, %0 : i32, i32
  }
  func.func @transform_5(%arg0: i32, %arg1: i32, %arg2: i32) -> (i32, i32) {
    %c0_i32 = arith.constant 0 : i32
    return %arg0, %arg1 : i32, i32
  }
}

</mosaic_0001>

<bundles_post_ra>
// kernel: tpu_custom_call.1
= control target key start
LH: loop header
LB: loop body
LE: loop exit
PB: predicated region body
PF: predicated region fallthrough
CT: control target
= control target key end

     0   :  { %s2766_s0 = inlined_call_operand.hbm [shape: f32[128,256], index: 0, kind: input, shape index: {}]   ;;  %s2767_s1 = inlined_call_operand.hbm [shape: f32[256,512], index: 1, kind: input, shape index: {}]   ;;  %s2768_s2 = inlined_call_operand.hbm [shape: f32[256,512], index: 2, kind: input, shape index: {}]   ;;  %s2769_s3 = inlined_call_operand.hbm [shape: f32[1,512], index: 3, kind: input, shape index: {}]   ;;  %s2770_s4 = inlined_call_operand.hbm [shape: f32[1,512], index: 4, kind: input, shape index: {}]   ;;  %s2771_s5 = inlined_call_operand.hbm [shape: f32[128,256], index: 5, kind: output, shape index: {}]  }
   0x1   :  { %2805 = sst [smem:[#allocation48_spill]] %s2766_s0 }
   0x2   :  { %2806 = sst [smem:[#allocation49_spill]] %s2767_s1 }
   0x3   :  { %2807 = sst [smem:[#allocation50_spill]] %s2768_s2 }
   0x4   :  { %2808 = sst [smem:[#allocation51_spill]] %s2769_s3 }
   0x5   :  { %2809 = sst [smem:[#allocation52_spill]] %s2770_s4 }
   0x6   :  { %2810 = sst [smem:[#allocation53_spill]] %s2771_s5 }
   0x7   :  { %10 = vsyncpa [#allocation5], 0 }
   0x8   :  { %12 = vsyncpa [#allocation5 + $0x1], 0 }
   0x9   :  { %13 = vsyncpa [#allocation8], 0 }
   0xa   :  { %15 = vsyncpa [#allocation8 + $0x1], 0 }
   0xb   :  { %16 = vsyncpa [#allocation11], 0 }
   0xc   :  { %18 = vsyncpa [#allocation11 + $0x1], 0 }
   0xd   :  { %19 = vsyncpa [#allocation6], 0 }
   0xe   :  { %21 = vsyncpa [#allocation6 + $0x1], 0  ;;  %s1989_s18 = smov 0   ;;  %s1991_s19 = smov 0  }
   0xf   :  { %s1993_s20 = smov 0   ;;  %s1995_s21 = smov 0  }
  0x10   :  { %s1997_s22 = smov 0   ;;  %s1999_s23 = smov 0  }
  0x11   :  { %s2001_s24 = smov 0   ;;  %s2003_s25 = smov 0  }
  0x12   :  { %s2005_s26 = smov 0   ;;  %s2007_s27 = smov 0  }
  0x13   :  { %s2009_s28 = smov 0   ;;  %s2011_s29 = smov 0  }
  0x14   :  { %s2013_s30 = smov 0   ;;  %s2015_s6 = smov 0  }
  0x15   :  { %s2017_s7 = smov 0   ;;  %s2019_s8 = smov 0  }
  0x16   :  { %2811 = sst [smem:[#allocation20_spill]] %s2019_s8  ;;  %s2021_s9 = smov 0  }
  0x17   :  { %s2023_s10 = smov 0   ;;  %s2025_s11 = smov 0  }
  0x18   :  { %s2027_s12 = smov 0   ;;  %s2029_s13 = smov 0  }
  0x19   :  { %2812 = sst [smem:[#allocation21_spill]] %s2027_s12  ;;  %s2031_s14 = smov 0  }
  0x1a   :  { %s2033_s15 = smov 0   ;;  %s2035_s16 = smov 0  }
  0x1b   :  { %s2037_s17 = smov 0  }
  0x1c LB: > { %s2815_s8 = sld [smem:[#allocation20_spill]]  ;;  %s2113_s5 = sadd.s32 4294967295, %s1950_s17   ;;  %s1950_s17 = sphi %s2037_s17, %s27_s17   ;;  %s1946_s16 = sphi %s2035_s16, %s2953_s16   ;;  %s1942_s15 = sphi %s2033_s15, %s2952_s15   ;;  %s1938_s14 = sphi %s2031_s14, %s2951_s14   ;;  %s1934_s13 = sphi %s2029_s13, %s2950_s13   ;;  %s1926_s11 = sphi %s2025_s11, %s2948_s11   ;;  %s1922_s10 = sphi %s2023_s10, %s2947_s10   ;;  %s1918_s9 = sphi %s2021_s9, %s2946_s9   ;;  %s1910_s7 = sphi %s2017_s7, %s2930_s7   ;;  %s1906_s6 = sphi %s2015_s6, %s2929_s6   ;;  %s1902_s30 = sphi %s2013_s30, %s2928_s30   ;;  %s1898_s29 = sphi %s2011_s29, %s2944_s29   ;;  %s1894_s28 = sphi %s2009_s28, %s2943_s28   ;;  %s1890_s27 = sphi %s2007_s27, %s2925_s27   ;;  %s1886_s26 = sphi %s2005_s26, %s2941_s26   ;;  %s1882_s25 = sphi %s2003_s25, %s2939_s25   ;;  %s1878_s24 = sphi %s2001_s24, %s2937_s24   ;;  %s1874_s23 = sphi %s1999_s23, %s2935_s23   ;;  %s1870_s22 = sphi %s1997_s22, %s2922_s22   ;;  %s1866_s21 = sphi %s1995_s21, %s2921_s21   ;;  %s1862_s20 = sphi %s1993_s20, %s2920_s20   ;;  %s1858_s19 = sphi %s1991_s19, %s2919_s19   ;;  %s1854_s18 = sphi %s1989_s18, %s2918_s18  }
  0x1d   : > { %2816 = sst [smem:[#allocation20_spill]] %s1854_s18  ;;  %p2791_p1 = scmp.eq.s32.totalorder %s1950_s17, 0 }
  0x1e   : > { %2817 = sst [smem:[#allocation22_spill]] %s1858_s19  ;;  %p2802_p2 = scmp.eq.s32.totalorder %s2113_s5, 0 }
  0x1f   : > { %2818 = sst [smem:[#allocation23_spill]] %s1862_s20  ;;  %p90_p3 = scmp.ne.s32.totalorder %s1910_s7, %s1906_s6 }
  0x20   : > { %2819 = sst [smem:[#allocation24_spill]] %s1866_s21  ;;  %p96_p4 = scmp.ne.s32.totalorder %s1906_s6, %s1902_s30 }
  0x21   : > { %s2820_s12 = sld [smem:[#allocation21_spill]]  ;;  %p2136_p5 = por %p90_p3, %p2791_p1 }
  0x22   : > { %2821 = sst [smem:[#allocation21_spill]] %s1870_s22  ;;  %p2142_p6 = por %p96_p4, %p2802_p2 }
  0x23   : > { %2822 = sst [smem:[#allocation25_spill]] %s1874_s23  ;;  %p2792_p7 = scmp.lt.s32.totalorder %s1950_s17, 8 }
  0x24   : > { %2823 = sst [smem:[#allocation26_spill]] %s1886_s26  ;;  %s258_s23 = sand.u32 1, %s1910_s7  }
  0x25   : > { %2824 = sst [smem:[#allocation27_spill]] %s1890_s27  ;;  %s1228_s0 = sshll.u32 %s258_s23, 7 }
  0x26   : > { %2825 = sst [smem:[#allocation28_spill]] %s1894_s28  ;;  %s1257_s30 = sshll.u32 %s1938_s14, 6 }
  0x27   : > { %2826 = sst [smem:[#allocation29_spill]] %s1898_s29  ;;  %s260_s27 = scalar_lea.vmem [#allocation7], %s1228_s0 }
  0x28   : > { %2827 = sst [smem:[#allocation30_spill]] %s1906_s6  ;;  %s265_s6 = sadd.s32 %s1942_s15, %s1257_s30 }
  0x29   : > { %2828 = sst [smem:[#allocation31_spill]] %s1910_s7  ;;  %s270_s28 = sshll.u32 %s260_s27, 4  ;;  %s271_s28 = int_to_ptr.vmem [resolvable:$true] %s270_s28 }
  0x2a   : > { %2829 = sst [smem:[#allocation32_spill]] %s1922_s10  ;;  %p1307_p8 = pnand %p2792_p7, %p2136_p5 }
  0x2b   : > { %2830 = sst [smem:[#allocation33_spill]] %s1926_s11  ;;  %s2788_s11 = sand.u32 1, %s1950_s17  }
  0x2c   : > { %2831 = sst [smem:[#allocation34_spill]] %s2820_s12  ;;  %s39_s12 = sadd.s32 1, %s1938_s14 }
  0x2d   : > { %2832 = sst [smem:[#allocation35_spill]] %s1934_s13  ;;  %p2116_p0 = scmp.ge.s32.totalorder %s39_s12, 2 }
  0x2e   : > { %2833 = sst [smem:[#allocation36_spill]] %s1938_s14  ;;  %s2163_s18 = scalar_lea.sflag [#allocation8], %s2788_s11 }
  0x2f   : > { %2834 = sst [smem:[#allocation37_spill]] %s1946_s16  ;;  %s2955_s12 = smov (%p2116_p0, %s39_s12), 0 }
  0x30   : > { %2836 = sst [smem:[#allocation38_spill]] %s2955_s12  ;;  %s2132_s4 = ssub.s32 %s1938_s14, %s2955_s12 }
  0x31   : > { %s1231_s12 = sshll.u32 %s265_s6, 3  ;;  %s2839_s1 = sld [smem:[#allocation49_spill]] }
  0x32   : > { %s2840_s2 = sld [smem:[#allocation50_spill]]  ;;  %s2783_s21 = smov 128  }
  0x33   : > { %s2785_s27 = smov 8   ;;  %p1235_p9 = scmp.ge.s32.totalorder %s1950_s17, 1 }
  0x34   : > { %p338_p10 = scmp.lt.s32.totalorder %s1950_s17, 9  ;;  %s42_s23 = sadd.s32 1, %s1942_s15 }
  0x35   : > { %s139_s30 = sadd.s32 1, %s1886_s26  ;;  %s2957_s23 = smov (!%p2116_p0, %s42_s23), %s1942_s15 }
  0x36   : > { %p2174_p11 = pnand %p1235_p9, %p338_p10  ;;  %p146_p12 = scmp.ne.s32.totalorder %s1886_s26, %s1882_s25 }
  0x37   : > { %s267_s19 = scalar_lea.hbm %s2839_s1, %s1231_s12  ;;  %p152_p13 = scmp.ne.s32.totalorder %s1882_s25, %s1878_s24 }
  0x38   : > { %s268_s20 = sshll.u32 %s267_s19, 4  ;;  %s1095_s0 = scalar_lea.hbm %s2840_s2, %s1231_s12  ;;  %s269_s20 = int_to_ptr.hbm [resolvable:$true] %s268_s20 }
  0x39   : > { %s2782_s19 = smov 512   ;;  %s1096_s29 = scalar_lea.hbm %s1095_s0, 16 }
  0x3a   : > { %1309 = dma.hbm_to_vmem [thread:$0]  (!%p1307_p8), %s269_s20, 2048, %s271_s28, %s2163_s18, %s2782_s19, %s2783_s21, %s2785_s27  }
  0x3b   : > { %s2170_s6 = sshll.u32 %s1096_s29, 4  ;;  %p44_p3 = scmp.ge.s32.totalorder %s2957_s23, 2 }
  0x3c   : > { %2841 = sst [smem:[#allocation39_spill]] %s2170_s6  ;;  %p2189_p4 = por %p146_p12, %p2791_p1 }
  0x3d   : > { %p2195_p5 = por %p152_p13, %p2802_p2  ;;  %s307_s0 = sand.u32 1, %s1886_s26  }
  0x3e   : > { %s2200_s13 = scalar_select %p44_p3, 0, %s2957_s23  }
  0x3f   : > { %s2844_s28 = scalar_select %p2195_p5, 1, 0 }
  0x40   : > { %s2846_s3 = sld [smem:[#allocation51_spill]]  ;;  %s2209_s21 = ssub.s32 %s1942_s15, %s2200_s13 }
  0x41   : > { %2845 = sst [smem:[#allocation40_spill]] %s2844_s28  ;;  %s80_s27 = sor.u32 %s2209_s21, %s2132_s4 }
  0x42   : > { %p137_p0 = scmp.eq.s32.totalorder %s2209_s21, 0  ;;  %p81_p8 = scmp.eq.s32.totalorder %s80_s27, 0 }
  0x43   : > { %s2848_s24 = sadd.s32 1, %s1910_s7  ;;  %s2849_s29 = sld [smem:[#allocation23_spill]] }
  0x44   : > { %s2215_s11 = scalar_select %p137_p0, %s1886_s26, %s139_s30  }
  0x45   : > { %s2220_s1 = scalar_select %p81_p8, %s1910_s7, %s2848_s24  }
  0x46   : > { %s311_s19 = scalar_lea.hbm %s2846_s3, %s1942_s15  ;;  %2847 = sst [smem:[#allocation41_spill]] %s2215_s11 }
  0x47   : > { %s313_s6 = sshll.u32 %s311_s19, 4  ;;  %2850 = sst [smem:[#allocation42_spill]] %s2220_s1  ;;  %s314_s6 = int_to_ptr.hbm [resolvable:$true] %s313_s6 }
  0x48   : > { %s308_s2 = scalar_lea.vmem [#allocation10], %s307_s0  ;;  %s2851_s28 = sld [smem:[#allocation22_spill]] }
  0x49   : > { %s315_s3 = sshll.u32 %s308_s2, 4  ;;  %p1313_p9 = pnand %p2792_p7, %p2189_p4  ;;  %s316_s3 = int_to_ptr.vmem [resolvable:$true] %s315_s3 }
  0x4a   : > { %s2852_s27 = sand.u32 1, %s1950_s17   ;;  %s2853_s30 = sld [smem:[#allocation20_spill]] }
  0x4b   : > { %s2228_s19 = scalar_lea.sflag [#allocation11], %s2852_s27  ;;  %s1221_s24 = sadd.s32 4294967294, %s1950_s17  }
  0x4c   : > { %1315 = dma.hbm_to_vmem [thread:$0]  (!%p1313_p9), %s314_s6, 16, %s316_s3, %s2228_s19  }
  0x4d   : > { %s46_s0 = sadd.s32 1, %s1946_s16  ;;  %s55_s2 = sadd.s32 1, %s1922_s10 }
  0x4e   : > { %s2959_s0 = smov (!%p44_p3, %s46_s0), %s1946_s16  ;;  %p62_p10 = scmp.ne.s32.totalorder %s1922_s10, %s1918_s9 }
  0x4f   : > { %p68_p12 = scmp.ne.s32.totalorder %s1918_s9, %s2815_s8  ;;  %p48_p13 = scmp.ge.s32.totalorder %s2959_s0, 2 }
  0x50   : > { %s195_s20 = sadd.s32 1, %s2849_s29  ;;  %p2243_p4 = por %p2791_p1, %p62_p10 }
  0x51   : > { %p2249_p0 = por %p2802_p2, %p68_p12  ;;  %s2961_s0 = smov (%p48_p13, %s2959_s0), 0 }
  0x52   : > { %2856 = sst [smem:[#allocation43_spill]] %s2961_s0  ;;  %p205_p3 = scmp.ne.s32.totalorder %s2849_s29, %s2851_s28 }
  0x53   : > { %p206_p8 = scmp.eq.s32.totalorder %s2113_s5, 7  ;;  %s50_s8 = ssub.s32 %s1946_s16, %s2961_s0 }
  0x54   : > { %p211_p9 = scmp.ne.s32.totalorder %s2851_s28, %s2853_s30  ;;  %s52_s6 = sor.u32 %s2132_s4, %s50_s8 }
  0x55   : > { %s192_s23 = sor.u32 %s2209_s21, %s50_s8  ;;  %p53_p10 = scmp.eq.s32.totalorder %s52_s6, 0 }
  0x56   : > { %p193_p1 = scmp.eq.s32.totalorder %s192_s23, 0  ;;  %p2264_p7 = por %p206_p8, %p205_p3 }
  0x57   : > { %p212_p12 = scmp.eq.s32.totalorder %s1221_s24, 7  ;;  %s2863_s28 = sld [smem:[#allocation29_spill]] }
  0x58   : > { %s2857_s1 = scalar_select %p2264_p7, 1, 0 }
  0x59   : > { %s2269_s7 = scalar_select %p53_p10, %s1922_s10, %s55_s2  }
  0x5a   : > { %2858 = sst [smem:[#allocation44_spill]] %s2857_s1  ;;  %s2963_s29 = smov (!%p193_p1, %s2849_s29), %s195_s20 }
  0x5b   : > { %2859 = sst [smem:[#allocation45_spill]] %s2269_s7  ;;  %p2274_p13 = por %p212_p12, %p211_p9 }
  0x5c   : > { %2860 = sst [smem:[#allocation46_spill]] %s2963_s29  ;;  %s232_s30 = sand.u32 1, %s1922_s10  }
  0x5d   : > { %s2861_s11 = scalar_select %p2274_p13, 1, 0 }
  0x5e   : > { %s2864_s21 = sld [smem:[#allocation28_spill]]  ;;  %s1224_s8 = sshll.u32 %s232_s30, 6 }
  0x5f   : > { %2862 = sst [smem:[#allocation47_spill]] %s2861_s11  ;;  %s1256_s23 = sshll.u32 %s1946_s16, 4 }
  0x60   : > { %s2865_s6 = sld [smem:[#allocation27_spill]]  ;;  %s241_s0 = sadd.s32 %s1938_s14, %s1256_s23 }
  0x61   : > { %s236_s24 = scalar_lea.vmem [#allocation4], %s1224_s8  ;;  %s1227_s20 = sshll.u32 %s241_s0, 3 }
  0x62   : > { %s246_s2 = sshll.u32 %s236_s24, 4  ;;  %s2866_s29 = sld [smem:[#allocation48_spill]]  ;;  %s247_s2 = int_to_ptr.vmem [resolvable:$true] %s246_s2 }
  0x63   : > { %p2867_p1 = scmp.lt.s32.totalorder %s1950_s17, 8  ;;  %s2868_s1 = sld [smem:[#allocation39_spill]] }
  0x64   : > { %s233_s23 = scalar_lea.sflag [#allocation5], %s232_s30  ;;  %s1955_s8 = smov 256  }
  0x65   : > { %p1304_p3 = pnand %p2867_p1, %p2243_p4  ;;  %s2869_s24 = smov 8  }
  0x66   : > { %s2870_s16 = smov 128   ;;  %s2871_s0 = sld [smem:[#allocation25_spill]] }
  0x67   : > { %s113_s14 = sadd.s32 1, %s2863_s28  ;;  %p120_p8 = scmp.ne.s32.totalorder %s2863_s28, %s2864_s21 }
  0x68   : > { %s243_s11 = scalar_lea.hbm %s2866_s29, %s1227_s20  ;;  %p126_p9 = scmp.ne.s32.totalorder %s2864_s21, %s2865_s6 }
  0x69   : > { %s244_s10 = sshll.u32 %s243_s11, 4  ;;  %s282_s26 = sand.u32 1, %s2863_s28   ;;  %s245_s10 = int_to_ptr.hbm [resolvable:$true] %s244_s10 }
  0x6a   : > { %1306 = dma.hbm_to_vmem [thread:$0]  (!%p1304_p3), %s245_s10, 1024, %s247_s2, %s233_s23, %s1955_s8, %s2870_s16, %s2869_s24  }
  0x6b   : > { %p2872_p10 = scmp.eq.s32.totalorder %s1950_s17, 0  ;;  %s2873_s7 = sld [smem:[#allocation21_spill]] }
  0x6c   : > { %s1232_s11 = sshll.u32 %s282_s26, 7  ;;  %p2300_p12 = por %p126_p9, %p2802_p2 }
  0x6d   : > { %p122_p4 = por %p120_p8, %p2872_p10  ;;  %s284_s10 = scalar_lea.vmem [#allocation9], %s1232_s11 }
  0x6e   : > { %s2875_s27 = sld [smem:[#allocation24_spill]]  ;;  %s295_s30 = sshll.u32 %s284_s10, 4  ;;  %s296_s30 = int_to_ptr.vmem [resolvable:$true] %s295_s30 }
  0x6f   : > { %p1310_p3 = pnand %p2867_p1, %p122_p4  ;;  %s2876_s21 = smov 512  }
  0x70   : > { %s2877_s6 = int_to_ptr.hbm [resolvable:$true] %s2868_s1  ;;  %s106_s2 = sadd.s32 2, %s1942_s15 }
  0x71   : > { %1312 = dma.hbm_to_vmem [thread:$0]  (!%p1310_p3), %s2877_s6, 2048, %s296_s30, %s2163_s18, %s2876_s21, %s2870_s16, %s2869_s24  }
  0x72   : > { %s107_s20 = sadd.s32 2, %s2200_s13  ;;  %s167_s8 = sadd.s32 1, %s2871_s0 }
  0x73   : > { %s109_s23 = ssub.s32 %s106_s2, %s107_s20  ;;  %p174_p10 = scmp.ne.s32.totalorder %s2871_s0, %s2873_s7 }
  0x74   : > { %s110_s26 = sor.u32 %s109_s23, %s2132_s4  ;;  %p165_p8 = scmp.eq.s32.totalorder %s109_s23, 0 }
  0x75   : > { %p111_p9 = scmp.eq.s32.totalorder %s110_s26, 0  ;;  %p2878_p4 = scmp.eq.s32.totalorder %s1950_s17, 0 }
  0x76   : > { %s2319_s11 = scalar_select %p165_p8, %s2871_s0, %s167_s8  }
  0x77   : > { %s2965_s28 = smov (!%p111_p9, %s2863_s28), %s113_s14  ;;  %p176_p1 = por %p174_p10, %p2878_p4 }
  0x78   : > { %p180_p2 = scmp.ne.s32.totalorder %s2873_s7, %s2875_s27  ;;  %s324_s1 = sand.u32 1, %s2871_s0  }
  0x79   : > { %s2879_s18 = sld [smem:[#allocation52_spill]]  ;;  %p2880_p3 = scmp.eq.s32.totalorder %s2113_s5, 0 }
  0x7a   : > { %s325_s21 = scalar_lea.vmem [#allocation12], %s324_s1  ;;  %p2882_p8 = scmp.lt.s32.totalorder %s1950_s17, 8 }
  0x7b   : > { %p2335_p13 = por %p180_p2, %p2880_p3  ;;  %s333_s6 = sshll.u32 %s325_s21, 4  ;;  %s334_s6 = int_to_ptr.vmem [resolvable:$true] %s333_s6 }
  0x7c   : > { %p1316_p9 = pnand %p2882_p8, %p176_p1  ;;  %s344_s14 = sand.u32 (!%p2174_p11), 1, %s1918_s9  }
  0x7d   : > { %s1236_s0 = sshll.u32 (!%p2174_p11), %s344_s14, 6  ;;  %s345_s7 = scalar_lea.sflag (!%p2174_p11), [#allocation5], %s344_s14 }
  0x7e   : > { %342 = sbr.rel (%p2174_p11) target bundleno = 524 (0x20c), region = 40  ;;  %s2345_s27 = scalar_lea.vmem (!%p2174_p11), [#allocation4], %s1236_s0 }
  0x7f   : > { %s1102_s24 = scalar_lea.hbm %s2879_s18, %s1942_s15 }
  0x80   : > { %s1103_s30 = scalar_lea.hbm %s1102_s24, 2 }
  0x81   : > { %s331_s2 = sshll.u32 %s1103_s30, 4  ;;  %s332_s2 = int_to_ptr.hbm [resolvable:$true] %s331_s2 }
  0x82   : > { %1318 = dma.hbm_to_vmem [thread:$0]  (!%p1316_p9), %s332_s2, 16, %s334_s6, %s2228_s19  }
  0x83   : > { %1829 = dma.done.wait (%p2249_p0), %s345_s7, 1024  }
  0x84   : > { %1831 = vsyncadd (%p2249_p0), %s345_s7, 4294966272  ;;  %s2883_s20 = sld [smem:[#allocation30_spill]]  ;;  %s354_s23 = sand.u32 1, %s2113_s5  }
  0x85   : > { %s355_s12 = scalar_lea.sflag [#allocation8], %s354_s23 }
  0x8a   : > { %s356_s19 = sand.u32 1, %s2883_s20  }
  0x8b   : > { %s1237_s8 = sshll.u32 %s356_s19, 7 }
  0x8c   : > { %s2353_s26 = scalar_lea.vmem [#allocation7], %s1237_s8 }
  0x8d   : > { %1833 = dma.done.wait (%p2142_p6), %s355_s12, 2048  }
  0x8e   : > { %1835 = vsyncadd (%p2142_p6), %s355_s12, 4294965248  ;;  %s2884_s1 = sld [smem:[#allocation28_spill]] }
  0x94   : > { %s366_s10 = sand.u32 1, %s2884_s1  }
  0x95   : > { %s1238_s16 = sshll.u32 %s366_s10, 7 }
  0x96   : > { %s2360_s3 = scalar_lea.vmem [#allocation9], %s1238_s16 }
  0x97   : > { %1837 = dma.done.wait (%p2300_p12), %s355_s12, 2048  }
  0x98   : > { %1839 = vsyncadd (%p2300_p12), %s355_s12, 4294965248  ;;  %s376_s18 = sand.u32 1, %s1882_s25   ;;  %s375_s24 = scalar_lea.sflag [#allocation11], %s354_s23 }
  0x99   : > { %s377_s30 = scalar_lea.vmem [#allocation10], %s376_s18 }
  0x9a   : > { %1841 = dma.done.wait (%p2195_p5), %s375_s24, 16  }
  0x9b   : > { %1843 = vsyncadd (%p2195_p5), %s375_s24, 4294967280  ;;  %s2886_s22 = sld [smem:[#allocation21_spill]] }
  0xa1   : > { %s385_s21 = sand.u32 1, %s2886_s22  }
  0xa2   : > { %s386_s6 = scalar_lea.vmem [#allocation12], %s385_s21 }
  0xa3   : > { %1845 = dma.done.wait (%p2335_p13), %s375_s24, 16  }
  0xa4   : > { %1847 = vsyncadd (%p2335_p13), %s375_s24, 4294967280  ;;  %s2887_s29 = sld [smem:[#allocation22_spill]] }
  0xa5   : > { %s2888_s7 = sld [smem:[#allocation33_spill]] }
  0xaa   : > { %s429_s2 = sand.u32 1, %s2887_s29  }
  0xab   : > { %s1239_s14 = sshll.u32 %s429_s2, 6  ;;  %p1240_p2 = scmp.ne.s32.totalorder %s2888_s7, 0 }
  0xac   : > { %s2379_s0 = scalar_lea.vmem [#allocation13], %s1239_s14 }
  0xad   : > { %441 = sbr.rel (%p1240_p2) target bundleno = 195 (0xc3), region = 64 }
  0xb2   : > { %v1532_v0 = vld [vmem:[%s377_s30] ss:$0 sm:$0xff] }
  0xb3   : > { %446 = vst [vmem:[#allocation2 + $0x30] sm:$0xff] %v1532_v0  ;;  %v1533_v1 = vld [vmem:[%s386_s6] ss:$0 sm:$0xff] }
  0xb4   : > { %447 = vst [vmem:[#allocation2] sm:$0xff] %v1532_v0 }
  0xb5   : > { %448 = vst [vmem:[#allocation2 + $0x18] sm:$0xff] %v1532_v0 }
  0xb6   : > { %449 = vst [vmem:[#allocation2 + $0x10] sm:$0xff] %v1532_v0 }
  0xb7   : > { %450 = vst [vmem:[#allocation2 + $0x8] sm:$0xff] %v1532_v0 }
  0xb8   : > { %451 = vst [vmem:[#allocation2 + $0x20] sm:$0xff] %v1532_v0 }
  0xb9   : > { %452 = vst [vmem:[#allocation2 + $0x28] sm:$0xff] %v1532_v0 }
  0xba   : > { %453 = vst [vmem:[#allocation2 + $0x38] sm:$0xff] %v1532_v0 }
  0xbb   : > { %458 = vst [vmem:[#allocation3] sm:$0xff] %v1533_v1 }
  0xbc   : > { %459 = vst [vmem:[#allocation3 + $0x18] sm:$0xff] %v1533_v1 }
  0xbd   : > { %460 = vst [vmem:[#allocation3 + $0x10] sm:$0xff] %v1533_v1 }
  0xbe   : > { %461 = vst [vmem:[#allocation3 + $0x20] sm:$0xff] %v1533_v1 }
  0xbf   : > { %462 = vst [vmem:[#allocation3 + $0x28] sm:$0xff] %v1533_v1 }
  0xc0   : > { %463 = vst [vmem:[#allocation3 + $0x8] sm:$0xff] %v1533_v1 }
  0xc1   : > { %464 = vst [vmem:[#allocation3 + $0x30] sm:$0xff] %v1533_v1 }
  0xc2   : > { %465 = vst [vmem:[#allocation3 + $0x38] sm:$0xff] %v1533_v1 }
  0xc3 PF: > { %v497_v2 = vld [vmem:[%s2353_s26 + $0x78] sm:$0xff]  ;;  %v496_v4 = vld [vmem:[%s2353_s26 + $0x70] sm:$0xff]  ;;  %v495_v6 = vld [vmem:[%s2353_s26 + $0x68] sm:$0xff]  ;;  %s2889_s4 = sld [smem:[#allocation33_spill]] }
  0xc4   : > { %v578_v3 = vld [vmem:[%s2360_s3 + $0x78] sm:$0xff]  ;;  %1259 = vmatpush.msra.mxu2 %v497_v2  ;;  %v577_v5 = vld [vmem:[%s2360_s3 + $0x70] sm:$0xff]  ;;  %v576_v7 = vld [vmem:[%s2360_s3 + $0x68] sm:$0xff]  ;;  %498 = vmatpush.msra.mxu0 %v497_v2 }
  0xc5   : > { %1275 = vmatpush.msra.mxu3 %v578_v3  ;;  %579 = vmatpush.msra.mxu1 %v578_v3  ;;  %v494_v8 = vld [vmem:[%s2353_s26 + $0x60] sm:$0xff]  ;;  %v493_v10 = vld [vmem:[%s2353_s26 + $0x58] sm:$0xff]  ;;  %v492_v12 = vld [vmem:[%s2353_s26 + $0x50] sm:$0xff] }
  0xc6   : > { %1260 = vmatpush.msra.mxu2 %v496_v4  ;;  %v575_v9 = vld [vmem:[%s2360_s3 + $0x60] sm:$0xff]  ;;  %499 = vmatpush.msra.mxu0 %v496_v4  ;;  %v574_v11 = vld [vmem:[%s2360_s3 + $0x58] sm:$0xff]  ;;  %v573_v13 = vld [vmem:[%s2360_s3 + $0x50] sm:$0xff] }
  0xc7   : > { %1276 = vmatpush.msra.mxu3 %v577_v5  ;;  %580 = vmatpush.msra.mxu1 %v577_v5  ;;  %v491_v14 = vld [vmem:[%s2353_s26 + $0x48] sm:$0xff]  ;;  %v490_v16 = vld [vmem:[%s2353_s26 + $0x40] sm:$0xff]  ;;  %v489_v18 = vld [vmem:[%s2353_s26 + $0x38] sm:$0xff] }
  0xc8   : > { %1261 = vmatpush.msra.mxu2 %v495_v6  ;;  %500 = vmatpush.msra.mxu0 %v495_v6  ;;  %v572_v15 = vld [vmem:[%s2360_s3 + $0x48] sm:$0xff]  ;;  %v571_v17 = vld [vmem:[%s2360_s3 + $0x40] sm:$0xff]  ;;  %v570_v19 = vld [vmem:[%s2360_s3 + $0x38] sm:$0xff] }
  0xc9   : > { %1277 = vmatpush.msra.mxu3 %v576_v7  ;;  %581 = vmatpush.msra.mxu1 %v576_v7  ;;  %v488_v20 = vld [vmem:[%s2353_s26 + $0x30] sm:$0xff]  ;;  %v487_v22 = vld [vmem:[%s2353_s26 + $0x28] sm:$0xff]  ;;  %v486_v24 = vld [vmem:[%s2353_s26 + $0x20] sm:$0xff]  ;;  %p1241_p6 = scmp.ne.s32.totalorder %s2889_s4, 1 }
  0xca   : > { %1262 = vmatpush.msra.mxu2 %v494_v8  ;;  %501 = vmatpush.msra.mxu0 %v494_v8  ;;  %v569_v21 = vld [vmem:[%s2360_s3 + $0x30] sm:$0xff]  ;;  %v568_v23 = vld [vmem:[%s2360_s3 + $0x28] sm:$0xff]  ;;  %v567_v25 = vld [vmem:[%s2360_s3 + $0x20] sm:$0xff] }
  0xcb   : > { %1278 = vmatpush.msra.mxu3 %v575_v9  ;;  %582 = vmatpush.msra.mxu1 %v575_v9  ;;  %v485_v26 = vld [vmem:[%s2353_s26 + $0x18] sm:$0xff]  ;;  %v484_v28 = vld [vmem:[%s2353_s26 + $0x10] sm:$0xff]  ;;  %v483_v30 = vld [vmem:[%s2353_s26 + $0x8] sm:$0xff] }
  0xcc   : > { %1263 = vmatpush.msra.mxu2 %v493_v10  ;;  %502 = vmatpush.msra.mxu0 %v493_v10  ;;  %v566_v27 = vld [vmem:[%s2360_s3 + $0x18] sm:$0xff]  ;;  %v565_v29 = vld [vmem:[%s2360_s3 + $0x10] sm:$0xff]  ;;  %v564_v31 = vld [vmem:[%s2360_s3 + $0x8] sm:$0xff] }
  0xcd   : > { %1279 = vmatpush.msra.mxu3 %v574_v11  ;;  %583 = vmatpush.msra.mxu1 %v574_v11  ;;  %v482_v32 = vld [vmem:[%s2353_s26] sm:$0xff]  ;;  %v471_v36 = vld [vmem:[%s2345_s27 + $0x28] sm:$0xff]  ;;  %v472_v38 = vld [vmem:[%s2345_s27 + $0x30] sm:$0xff] }
  0xce   : > { %1264 = vmatpush.msra.mxu2 %v492_v12  ;;  %503 = vmatpush.msra.mxu0 %v492_v12  ;;  %v563_v33 = vld [vmem:[%s2360_s3] sm:$0xff]  ;;  %v467_v37 = vld [vmem:[%s2345_s27 + $0x8] sm:$0xff]  ;;  %v468_v39 = vld [vmem:[%s2345_s27 + $0x10] sm:$0xff] }
  0xcf   : > { %1280 = vmatpush.msra.mxu3 %v573_v13  ;;  %584 = vmatpush.msra.mxu1 %v573_v13  ;;  %v470_v34 = vld [vmem:[%s2345_s27 + $0x20] sm:$0xff]  ;;  %v473_v40 = vld [vmem:[%s2345_s27 + $0x38] sm:$0xff]  ;;  %v474_v42 = vld [vmem:[#allocation2 + $0x30] sm:$0xff] }
  0xd0   : > { %1265 = vmatpush.msra.mxu2 %v491_v14  ;;  %504 = vmatpush.msra.mxu0 %v491_v14  ;;  %v466_v35 = vld [vmem:[%s2345_s27] sm:$0xff]  ;;  %v469_v41 = vld [vmem:[%s2345_s27 + $0x18] sm:$0xff]  ;;  %v478_v48 = vld [vmem:[#allocation2 + $0x8] sm:$0xff] }
  0xd1   : > { %1281 = vmatpush.msra.mxu3 %v572_v15  ;;  %585 = vmatpush.msra.mxu1 %v572_v15  ;;  %v555_v43 = vld [vmem:[#allocation3] sm:$0xff]  ;;  %v559_v49 = vld [vmem:[#allocation3 + $0x28] sm:$0xff]  ;;  %v556_v55 = vld [vmem:[#allocation3 + $0x18] sm:$0xff] }
  0xd2   : > { %1266 = vmatpush.msra.mxu2 %v490_v16  ;;  %505 = vmatpush.msra.mxu0 %v490_v16  ;;  %v475_v54 = vld [vmem:[#allocation2] sm:$0xff]  ;;  %v560_v61 = vld [vmem:[#allocation3 + $0x8] sm:$0xff]  ;;  %v476_v2 = vld [vmem:[#allocation2 + $0x18] sm:$0xff] }
  0xd3   : > { %1282 = vmatpush.msra.mxu3 %v571_v17  ;;  %586 = vmatpush.msra.mxu1 %v571_v17  ;;  %v479_v60 = vld [vmem:[#allocation2 + $0x20] sm:$0xff]  ;;  %v557_v3 = vld [vmem:[#allocation3 + $0x10] sm:$0xff]  ;;  %v480_v8 = vld [vmem:[#allocation2 + $0x28] sm:$0xff] }
  0xd4   : > { %1267 = vmatpush.msra.mxu2 %v489_v18  ;;  %506 = vmatpush.msra.mxu0 %v489_v18  ;;  %v561_v9 = vld [vmem:[#allocation3 + $0x30] sm:$0xff]  ;;  %v558_v15 = vld [vmem:[#allocation3 + $0x20] sm:$0xff] }
  0xd5   : > { %1283 = vmatpush.msra.mxu3 %v570_v19  ;;  %587 = vmatpush.msra.mxu1 %v570_v19  ;;  %v477_v14 = vld [vmem:[#allocation2 + $0x10] sm:$0xff] }
  0xd6   : > { %1268 = vmatpush.msra.mxu2 %v488_v20  ;;  %507 = vmatpush.msra.mxu0 %v488_v20  ;;  %v481_v20 = vld [vmem:[#allocation2 + $0x38] sm:$0xff] }
  0xd7   : > { %1284 = vmatpush.msra.mxu3 %v569_v21  ;;  %588 = vmatpush.msra.mxu1 %v569_v21  ;;  %v562_v21 = vld [vmem:[#allocation3 + $0x38] sm:$0xff] }
  0xd8   : > { %1269 = vmatpush.msra.mxu2 %v487_v22  ;;  %508 = vmatpush.msra.mxu0 %v487_v22 }
  0xd9   : > { %1285 = vmatpush.msra.mxu3 %v568_v23  ;;  %589 = vmatpush.msra.mxu1 %v568_v23 }
  0xda   : > { %1270 = vmatpush.msra.mxu2 %v486_v24  ;;  %509 = vmatpush.msra.mxu0 %v486_v24 }
  0xdb   : > { %1286 = vmatpush.msra.mxu3 %v567_v25  ;;  %590 = vmatpush.msra.mxu1 %v567_v25 }
  0xdc   : > { %1271 = vmatpush.msra.mxu2 %v485_v26  ;;  %510 = vmatpush.msra.mxu0 %v485_v26 }
  0xdd   : > { %1287 = vmatpush.msra.mxu3 %v566_v27  ;;  %591 = vmatpush.msra.mxu1 %v566_v27 }
  0xde   : > { %1272 = vmatpush.msra.mxu2 %v484_v28  ;;  %511 = vmatpush.msra.mxu0 %v484_v28 }
  0xdf   : > { %1288 = vmatpush.msra.mxu3 %v565_v29  ;;  %592 = vmatpush.msra.mxu1 %v565_v29 }
  0xe0   : > { %1273 = vmatpush.msra.mxu2 %v483_v30  ;;  %512 = vmatpush.msra.mxu0 %v483_v30 }
  0xe1   : > { %1289 = vmatpush.msra.mxu3 %v564_v31  ;;  %593 = vmatpush.msra.mxu1 %v564_v31 }
  0xe2   : > { %1274 = vmatpush.msra.mxu2 %v482_v32  ;;  %513 = vmatpush.msra.mxu0 %v482_v32 }
  0xe3   : > { %1290 = vmatpush.msra.mxu3 %v563_v33  ;;  %526 = vmatmul.f32.vlgmr.msra.gmra.mxu2 %v470_v34 }
  0xe4   : > { %607 = vmatmul.f32.vlgmr.msra.gmra.mxu3 %v470_v34  ;;  %594 = vmatpush.msra.mxu1 %v563_v33 }
  0xe5   : > { %514 = vmatmul.f32.vlgmr.msra.gmra.mxu0 %v466_v35  ;;  %595 = vmatmul.f32.vlgmr.msra.gmra.mxu1 %v466_v35 }
  0xeb   : > { %529 = vmatmul.f32.gmra.mxu2 %v471_v36 }
  0xec   : > { %610 = vmatmul.f32.gmra.mxu3 %v471_v36 }
  0xed   : > { %517 = vmatmul.f32.gmra.mxu0 %v467_v37  ;;  %598 = vmatmul.f32.gmra.mxu1 %v467_v37 }
  0xf3   : > { %532 = vmatmul.f32.gmra.mxu2 %v472_v38 }
  0xf4   : > { %613 = vmatmul.f32.gmra.mxu3 %v472_v38 }
  0xf5   : > { %520 = vmatmul.f32.gmra.mxu0 %v468_v39  ;;  %601 = vmatmul.f32.gmra.mxu1 %v468_v39 }
  0xfb   : > { %535 = vmatmul.f32.gmra.mxu2 %v473_v40 }
  0xfc   : > { %616 = vmatmul.f32.gmra.mxu3 %v473_v40 }
  0xfd   : > { %523 = vmatmul.f32.gmra.mxu0 %v469_v41  ;;  %604 = vmatmul.f32.gmra.mxu1 %v469_v41 }
 0x162   : > { %v515_v44 = vpop.f32.mrf.mxu0  ;;  %v596_v45 = vpop.f32.mrf.mxu1 }
 0x163   : > { %v539_v46 = vadd.f32 %v515_v44, %v474_v42  ;;  %v620_v47 = vadd.f32 %v596_v45, %v555_v43 }
 0x165   : > { %547 = vst [vmem:[#allocation2 + $0x30] sm:$0xff] %v539_v46 }
 0x166   : > { %v527_v50 = vpop.f32.mrf.mxu2  ;;  %628 = vst [vmem:[#allocation3] sm:$0xff] %v620_v47 }
 0x167   : > { %v608_v51 = vpop.f32.mrf.mxu3  ;;  %v543_v52 = vadd.f32 %v527_v50, %v478_v48 }
 0x168   : > { %v624_v53 = vadd.f32 %v608_v51, %v559_v49 }
 0x169   : > { %551 = vst [vmem:[#allocation2 + $0x8] sm:$0xff] %v543_v52 }
 0x16a   : > { %632 = vst [vmem:[#allocation3 + $0x28] sm:$0xff] %v624_v53  ;;  %v518_v56 = vpop.f32.mrf.mxu0  ;;  %v599_v57 = vpop.f32.mrf.mxu1 }
 0x16b   : > { %v540_v58 = vadd.f32 %v518_v56, %v475_v54  ;;  %v621_v59 = vadd.f32 %v599_v57, %v556_v55 }
 0x16d   : > { %548 = vst [vmem:[#allocation2] sm:$0xff] %v540_v58 }
 0x16e   : > { %v530_v62 = vpop.f32.mrf.mxu2  ;;  %629 = vst [vmem:[#allocation3 + $0x18] sm:$0xff] %v621_v59 }
 0x16f   : > { %v611_v63 = vpop.f32.mrf.mxu3  ;;  %v544_v0 = vadd.f32 %v530_v62, %v479_v60 }
 0x170   : > { %v625_v1 = vadd.f32 %v611_v63, %v560_v61 }
 0x171   : > { %552 = vst [vmem:[#allocation2 + $0x20] sm:$0xff] %v544_v0 }
 0x172   : > { %633 = vst [vmem:[#allocation3 + $0x8] sm:$0xff] %v625_v1  ;;  %v521_v4 = vpop.f32.mrf.mxu0  ;;  %v602_v5 = vpop.f32.mrf.mxu1 }
 0x173   : > { %v541_v6 = vadd.f32 %v521_v4, %v476_v2  ;;  %v622_v7 = vadd.f32 %v602_v5, %v557_v3 }
 0x175   : > { %549 = vst [vmem:[#allocation2 + $0x18] sm:$0xff] %v541_v6 }
 0x176   : > { %v533_v10 = vpop.f32.mrf.mxu2  ;;  %630 = vst [vmem:[#allocation3 + $0x10] sm:$0xff] %v622_v7 }
 0x177   : > { %v614_v11 = vpop.f32.mrf.mxu3  ;;  %v545_v12 = vadd.f32 %v533_v10, %v480_v8 }
 0x178   : > { %v626_v13 = vadd.f32 %v614_v11, %v561_v9 }
 0x179   : > { %553 = vst [vmem:[#allocation2 + $0x28] sm:$0xff] %v545_v12 }
 0x17a   : > { %634 = vst [vmem:[#allocation3 + $0x30] sm:$0xff] %v626_v13  ;;  %v524_v16 = vpop.f32.mrf.mxu0  ;;  %v605_v17 = vpop.f32.mrf.mxu1 }
 0x17b   : > { %v542_v18 = vadd.f32 %v524_v16, %v477_v14  ;;  %v623_v19 = vadd.f32 %v605_v17, %v558_v15 }
 0x17d   : > { %550 = vst [vmem:[#allocation2 + $0x10] sm:$0xff] %v542_v18 }
 0x17e   : > { %v536_v22 = vpop.f32.mrf.mxu2  ;;  %631 = vst [vmem:[#allocation3 + $0x20] sm:$0xff] %v623_v19  ;;  %639 = sbr.rel (%p1241_p6) target bundleno = 499 (0x1f3), region = 68 }
 0x17f   : > { %v617_v23 = vpop.f32.mrf.mxu3  ;;  %v546_v24 = vadd.f32 %v536_v22, %v481_v20 }
 0x180   : > { %v627_v25 = vadd.f32 %v617_v23, %v562_v21 }
 0x181   : > { %554 = vst [vmem:[#allocation2 + $0x38] sm:$0xff] %v546_v24 }
 0x182   : > { %635 = vst [vmem:[#allocation3 + $0x38] sm:$0xff] %v627_v25 }
 0x183   : > { %v2423_v26 = vld [vmem:[#allocation3] sm:$0xff]  ;;  %v2425_v27 = vld [vmem:[#allocation3 + $0x18] sm:$0xff]  ;;  %v2433_v30 = vld [vmem:[#allocation3 + $0x10] sm:$0xff] }
 0x184   : > { %v2428_v28 = vmul.f32 0.70710677, %v2423_v26  ;;  %v2431_v29 = vmul.f32 0.70710677, %v2425_v27  ;;  %v2436_v31 = vmul.f32 0.70710677, %v2433_v30 }
 0x185   : > { %v2438_v32 = vld [vmem:[#allocation3 + $0x20] sm:$0xff]  ;;  %v2465_v60 = vld [vmem:[#allocation3 + $0x28] sm:$0xff] }
 0x186   : > { %v672_v33 = vmul.f32 %v2428_v28, %v2428_v28  ;;  %v712_v34 = vmul.f32 %v2431_v29, %v2431_v29  ;;  %v752_v35 = vmul.f32 %v2436_v31, %v2436_v31  ;;  %v2447_v36 = vmul.f32 0.70710677, %v2438_v32  ;;  %v2471_v7 = vld [vmem:[#allocation3 + $0x8] sm:$0xff] }
 0x187   : > { %v2469_v6 = vmul.f32 0.70710677, %v2465_v60  ;;  %v2478_v17 = vmul.f32 0.70710677, %v2471_v7 }
 0x188   : > { %v673_v37 = vmin.f32 %v672_v33, 16.0  ;;  %v2449_v38 = vmin.f32 %v712_v34, 16.0  ;;  %v2451_v39 = vmin.f32 %v752_v35, 16.0  ;;  %v792_v46 = vmul.f32 %v2447_v36, %v2447_v36 }
 0x18a   : > { %v674_v40 = vmul.f32 2.1237322e-06, %v673_v37  ;;  %v685_v41 = vmul.f32 3.8918573e-05, %v673_v37  ;;  %v714_v42 = vmul.f32 2.1237322e-06, %v2449_v38 }
 0x18b   : > { %v725_v43 = vmul.f32 3.8918573e-05, %v2449_v38  ;;  %v754_v44 = vmul.f32 2.1237322e-06, %v2451_v39  ;;  %v765_v45 = vmul.f32 3.8918573e-05, %v2451_v39 }
 0x18c   : > { %v675_v47 = vadd.f32 0.00028619796, %v674_v40  ;;  %v686_v48 = vadd.f32 0.001143296, %v685_v41  ;;  %v715_v49 = vadd.f32 0.00028619796, %v714_v42 }
 0x18d   : > { %v726_v50 = vadd.f32 0.001143296, %v725_v43  ;;  %v755_v51 = vadd.f32 0.00028619796, %v754_v44  ;;  %v766_v52 = vadd.f32 0.001143296, %v765_v45 }
 0x18e   : > { %v676_v53 = vmul.f32 %v675_v47, %v673_v37  ;;  %v687_v54 = vmul.f32 %v686_v48, %v673_v37  ;;  %v716_v55 = vmul.f32 %v715_v49, %v2449_v38  ;;  %v2463_v59 = vmin.f32 %v792_v46, 16.0 }
 0x18f   : > { %v727_v56 = vmul.f32 %v726_v50, %v2449_v38  ;;  %v756_v57 = vmul.f32 %v755_v51, %v2451_v39  ;;  %v767_v58 = vmul.f32 %v766_v52, %v2451_v39  ;;  %v832_v47 = vmul.f32 %v2469_v6, %v2469_v6 }
 0x190   : > { %v677_v61 = vadd.f32 0.0036580483, %v676_v53  ;;  %v688_v62 = vadd.f32 0.014752088, %v687_v54  ;;  %v717_v63 = vadd.f32 0.0036580483, %v716_v55  ;;  %v872_v55 = vmul.f32 %v2478_v17, %v2478_v17 }
 0x191   : > { %v728_v0 = vadd.f32 0.014752088, %v727_v56  ;;  %v757_v1 = vadd.f32 0.0036580483, %v756_v57  ;;  %v768_v2 = vadd.f32 0.014752088, %v767_v58 }
 0x192   : > { %v678_v3 = vmul.f32 %v677_v61, %v673_v37  ;;  %v689_v4 = vmul.f32 %v688_v62, %v673_v37  ;;  %v718_v5 = vmul.f32 %v717_v63, %v2449_v38  ;;  %v794_v11 = vmul.f32 2.1237322e-06, %v2463_v59 }
 0x193   : > { %v729_v8 = vmul.f32 %v728_v0, %v2449_v38  ;;  %v758_v9 = vmul.f32 %v757_v1, %v2451_v39  ;;  %v769_v10 = vmul.f32 %v768_v2, %v2451_v39  ;;  %v805_v25 = vmul.f32 3.8918573e-05, %v2463_v59 }
 0x194   : > { %v679_v12 = vadd.f32 0.05243302, %v678_v3  ;;  %v690_v13 = vadd.f32 0.112945676, %v689_v4  ;;  %v719_v14 = vadd.f32 0.05243302, %v718_v5 }
 0x195   : > { %v730_v15 = vadd.f32 0.112945676, %v729_v8  ;;  %v759_v16 = vadd.f32 0.05243302, %v758_v9  ;;  %v770_v21 = vadd.f32 0.112945676, %v769_v10 }
 0x196   : > { %v680_v18 = vmul.f32 %v679_v12, %v673_v37  ;;  %v691_v19 = vmul.f32 %v690_v13, %v673_v37  ;;  %v720_v20 = vmul.f32 %v719_v14, %v2449_v38  ;;  %v795_v24 = vadd.f32 0.00028619796, %v794_v11 }
 0x197   : > { %v731_v22 = vmul.f32 %v730_v15, %v2449_v38  ;;  %v760_v23 = vmul.f32 %v759_v16, %v2451_v39  ;;  %v771_v40 = vmul.f32 %v770_v21, %v2451_v39  ;;  %v806_v51 = vadd.f32 0.001143296, %v805_v25 }
 0x198   : > { %v681_v33 = vadd.f32 0.18741608, %v680_v18  ;;  %v692_v34 = vadd.f32 0.4994258, %v691_v19  ;;  %v721_v35 = vadd.f32 0.18741608, %v720_v20  ;;  %v796_v43 = vmul.f32 %v795_v24, %v2463_v59 }
 0x199   : > { %v732_v41 = vadd.f32 0.4994258, %v731_v22  ;;  %v761_v42 = vadd.f32 0.18741608, %v760_v23  ;;  %v772_v46 = vadd.f32 0.4994258, %v771_v40  ;;  %v807_v57 = vmul.f32 %v806_v51, %v2463_v59 }
 0x19a   : > { %v682_v44 = vmul.f32 %v681_v33, %v673_v37  ;;  %v693_v45 = vmul.f32 %v692_v34, %v673_v37  ;;  %v722_v48 = vmul.f32 %v721_v35, %v2449_v38  ;;  %v797_v50 = vadd.f32 0.0036580483, %v796_v43 }
 0x19b   : > { %v733_v49 = vmul.f32 %v732_v41, %v2449_v38  ;;  %v762_v54 = vmul.f32 %v761_v42, %v2451_v39  ;;  %v773_v37 = vmul.f32 %v772_v46, %v2451_v39  ;;  %v2496_v61 = vmin.f32 %v832_v47, 16.0 }
 0x19c   : > { %v683_v52 = vadd.f32 1.1283791, %v682_v44  ;;  %v694_v53 = vadd.f32 1.0, %v693_v45  ;;  %v798_v58 = vmul.f32 %v797_v50, %v2463_v59  ;;  %v723_v62 = vadd.f32 1.1283791, %v722_v48 }
 0x19d   : > { %v734_v56 = vadd.f32 1.0, %v733_v49  ;;  %v763_v1 = vadd.f32 1.1283791, %v762_v54  ;;  %v2501_v2 = vmin.f32 %v872_v55, 16.0  ;;  %v774_v39 = vadd.f32 1.0, %v773_v37 }
 0x19e   : > { %1534 = vrcp.f32 %v694_v53  ;;  %v704_v38 = vand.u32 2147483647, %v694_v53  ;;  %v2499_v63 = vmul.f32 %v683_v52, %v2428_v28  ;;  %v706_v0 = vand.u32 2147483648, %v694_v53 }
 0x19f   : > { %1536 = vrcp.f32 %v734_v56  ;;  %v744_v3 = vand.u32 2147483647, %v734_v56  ;;  %v746_v4 = vand.u32 2147483648, %v734_v56  ;;  %v808_v5 = vadd.f32 0.014752088, %v807_v57 }
 0x1a0   : > { %vm700_vm0 = vweird.f32 %v694_v53  ;;  %v799_v8 = vadd.f32 0.05243302, %v798_v58  ;;  %v834_v9 = vmul.f32 2.1237322e-06, %v2496_v61  ;;  %v845_v10 = vmul.f32 3.8918573e-05, %v2496_v61 }
 0x1a1   : > { %vm2505_vm1 = vcmp.eq.f32.partialorder %v704_v38, 8.507059e+37  ;;  %v724_v28 = vmul.f32 %v723_v62, %v2431_v29  ;;  %vm740_vm2 = vweird.f32 %v734_v56  ;;  %1538 = vrcp.f32 %v774_v39 }
 0x1a2   : > { %v2511_v13 = vmul.f32 %v763_v1, %v2436_v31  ;;  %v809_v14 = vmul.f32 %v808_v5, %v2463_v59  ;;  %v835_v15 = vadd.f32 0.00028619796, %v834_v9  ;;  %v846_v16 = vadd.f32 0.001143296, %v845_v10 }
 0x1a3   : > { %v707_v20 = vor.u32 1.1754944e-38, %v706_v0  ;;  %vm2514_vm3 = vcmp.eq.f32.partialorder %v744_v3, 8.507059e+37  ;;  %v747_v22 = vor.u32 1.1754944e-38, %v746_v4  ;;  %v784_v29 = vand.u32 2147483647, %v774_v39 }
 0x1a4   : > { %v1535_v12 = vpop.eup %1534  ;;  %v800_v24 = vmul.f32 %v799_v8, %v2463_v59  ;;  %v810_v25 = vadd.f32 0.112945676, %v809_v14  ;;  %v836_v31 = vmul.f32 %v835_v15, %v2496_v61  ;;  %v847_v34 = vmul.f32 %v846_v16, %v2496_v61 }
 0x1a5   : > { %v1537_v18 = vpop.eup %1536  ;;  %v696_v19 = vmul.f32 %v1535_v12, %v694_v53  ;;  %vm701_vm4 = vweird.f32 %v1535_v12  ;;  %vm780_vm6 = vweird.f32 %v774_v39  ;;  %v786_v43 = vand.u32 2147483648, %v774_v39 }
 0x1a6   : > { %v736_v23 = vmul.f32 %v1537_v18, %v734_v56  ;;  %vm741_vm5 = vweird.f32 %v1537_v18  ;;  %v811_v40 = vmul.f32 %v810_v25, %v2463_v59  ;;  %v837_v44 = vadd.f32 0.0036580483, %v836_v31  ;;  %vm2523_vm7 = vmor %vm700_vm0, %vm701_vm4  ;;  %v640_v25 = vld [vmem:[#allocation2 + $0x30] sm:$0xff] }
 0x1a7   : > { %v697_v33 = vsub.f32 1.0, %v696_v19  ;;  %v1539_v41 = vpop.eup %1538  ;;  %v848_v45 = vadd.f32 0.014752088, %v847_v34  ;;  %vm2527_vm8 = vcmp.eq.f32.partialorder %v784_v29, 8.507059e+37  ;;  %v801_v50 = vadd.f32 0.18741608, %v800_v24  ;;  %vm2532_vm9 = vmor %vm740_vm2, %vm741_vm5 }
 0x1a8   : > { %v737_v35 = vsub.f32 1.0, %v736_v23  ;;  %v776_v48 = vmul.f32 %v1539_v41, %v774_v39  ;;  %v812_v54 = vadd.f32 0.4994258, %v811_v40  ;;  %v838_v53 = vmul.f32 %v837_v44, %v2496_v61  ;;  %v2569_v34 = vld [vmem:[#allocation3 + $0x30] sm:$0xff] }
 0x1a9   : > { %v698_v42 = vmul.f32 %v1535_v12, %v697_v33  ;;  %v849_v55 = vmul.f32 %v848_v45, %v2496_v61  ;;  %vm781_vm10 = vweird.f32 %v1539_v41  ;;  %v874_v58 = vmul.f32 2.1237322e-06, %v2501_v2 }
 0x1aa   : > { %v738_v47 = vmul.f32 %v1537_v18, %v737_v35  ;;  %v777_v57 = vsub.f32 1.0, %v776_v48  ;;  %v813_v62 = vmul.f32 %v812_v54, %v2463_v59  ;;  %v839_v56 = vadd.f32 0.05243302, %v838_v53  ;;  %vm2550_vm11 = vmor %vm780_vm6, %vm781_vm10  ;;  %v641_v35 = vld [vmem:[#allocation2] sm:$0xff]  ;;  %v2579_v53 = vld [vmem:[#allocation3 + $0x38] sm:$0xff] }
 0x1ab   : > { %v699_v51 = vadd.f32 %v1535_v12, %v698_v42  ;;  %v850_v0 = vadd.f32 0.112945676, %v849_v55  ;;  %v787_v5 = vor.u32 1.1754944e-38, %v786_v43  ;;  %v656_v19 = vmul.f32 0.5, %v2423_v26  ;;  %v642_v55 = vld [vmem:[#allocation2 + $0x18] sm:$0xff] }
 0x1ac   : > { %v739_v37 = vadd.f32 %v1537_v18, %v738_v47  ;;  %v778_v4 = vmul.f32 %v1539_v41, %v777_v57  ;;  %v840_v11 = vmul.f32 %v839_v56, %v2496_v61  ;;  %v657_v39 = vmul.f32 0.5, %v2425_v27 }
 0x1ad   : > { %v703_v38 = vsel %vm2523_vm7, %v1535_v12, %v699_v51  ;;  %v2554_v12 = vadd.f32 1.0, %v813_v62  ;;  %v851_v16 = vmul.f32 %v850_v0, %v2496_v61  ;;  %v658_v26 = vmul.f32 0.5, %v2433_v30 }
 0x1ae   : > { %v708_v1 = vsel %vm2505_vm1, %v707_v20, %v703_v38  ;;  %v743_v3 = vsel %vm2532_vm9, %v1537_v18, %v739_v37  ;;  %v779_v15 = vadd.f32 %v1539_v41, %v778_v4  ;;  %v875_v18 = vadd.f32 0.00028619796, %v874_v58 }
 0x1af   : > { %v709_v8 = vmul.f32 %v708_v1, %v2499_v63  ;;  %v748_v9 = vsel %vm2514_vm3, %v747_v22, %v743_v3  ;;  %v802_v20 = vmul.f32 %v801_v50, %v2463_v59  ;;  %1540 = vrcp.f32 %v2554_v12 }
 0x1b0   : > { %v749_v14 = vmul.f32 %v748_v9, %v724_v28  ;;  %v783_v22 = vsel %vm2550_vm11, %v1539_v41, %v779_v15  ;;  %v841_v23 = vadd.f32 0.18741608, %v840_v11  ;;  %v852_v24 = vadd.f32 0.4994258, %v851_v16 }
 0x1b1   : > { %v1242_v63 = vclamps-f32 %v709_v8, 1.0  ;;  %v788_v28 = vsel %vm2527_vm8, %v787_v5, %v783_v22  ;;  %v876_v31 = vmul.f32 %v875_v18, %v2501_v2  ;;  %v803_v40 = vadd.f32 1.1283791, %v802_v20 }
 0x1b2   : > { %v1243_v21 = vclamps-f32 %v749_v14, 1.0  ;;  %v789_v59 = vmul.f32 %v788_v28, %v2511_v13  ;;  %v853_v41 = vmul.f32 %v852_v24, %v2496_v61  ;;  %v885_v42 = vmul.f32 3.8918573e-05, %v2501_v2 }
 0x1b3   : > { %v992_v29 = vadd.f32 1.0, %v1242_v63  ;;  %v826_v45 = vand.u32 2147483648, %v2554_v12  ;;  %v842_v30 = vmul.f32 %v841_v23, %v2496_v61  ;;  %v2576_v49 = vmul.f32 0.70710677, %v2569_v34 }
 0x1b4   : > { %v993_v33 = vadd.f32 1.0, %v1243_v21  ;;  %v1244_v44 = vclamps-f32 %v789_v59, 1.0  ;;  %v854_v47 = vadd.f32 1.0, %v853_v41  ;;  %v886_v48 = vadd.f32 0.001143296, %v885_v42 }
 0x1b5   : > { %v1000_v27 = vmul.f32 %v992_v29, %v656_v19  ;;  %v1541_v46 = vpop.eup %1540  ;;  %v877_v54 = vadd.f32 0.0036580483, %v876_v31  ;;  %v2583_v37 = vmul.f32 0.5, %v2438_v32  ;;  %vm820_vm12 = vweird.f32 %v2554_v12 }
 0x1b6   : > { %v1001_v43 = vmul.f32 %v993_v33, %v657_v39  ;;  %v994_v51 = vadd.f32 1.0, %v1244_v44  ;;  %v816_v52 = vmul.f32 %v1541_v46, %v2554_v12  ;;  %v824_v61 = vand.u32 2147483647, %v2554_v12 }
 0x1b7   : > { %v1008_v13 = vmul.f32 %v1000_v27, %v640_v25  ;;  %1542 = vrcp.f32 %v854_v47  ;;  %vm821_vm13 = vweird.f32 %v1541_v46  ;;  %v843_v38 = vadd.f32 1.1283791, %v842_v30 }
 0x1b8   : > { %v1009_v50 = vmul.f32 %v1001_v43, %v641_v35  ;;  %v1002_v57 = vmul.f32 %v994_v51, %v658_v26  ;;  %v817_v58 = vsub.f32 1.0, %v816_v52  ;;  %v804_v62 = vmul.f32 %v803_v40, %v2447_v36  ;;  %vm2598_vm14 = vmor %vm820_vm12, %vm821_vm13  ;;  %v643_v52 = vld [vmem:[#allocation2 + $0x10] sm:$0xff] }
 0x1b9   : > { %1016 = vst [vmem:[%s2379_s0] sm:$0xff] %v1008_v13  ;;  %v887_v56 = vmul.f32 %v886_v48, %v2501_v2  ;;  %v912_v0 = vmul.f32 %v2576_v49, %v2576_v49  ;;  %v2593_v32 = vmul.f32 0.70710677, %v2579_v53  ;;  %v827_v4 = vor.u32 1.1754944e-38, %v826_v45 }
 0x1ba   : > { %1017 = vst [vmem:[%s2379_s0 + $0x8] sm:$0xff] %v1009_v50  ;;  %v1010_v1 = vmul.f32 %v1002_v57, %v642_v55  ;;  %v818_v3 = vmul.f32 %v1541_v46, %v817_v58  ;;  %v878_v5 = vmul.f32 %v877_v54, %v2501_v2  ;;  %v864_v36 = vand.u32 2147483647, %v854_v47 }
 0x1bb   : > { %v888_v9 = vadd.f32 0.014752088, %v887_v56  ;;  %v2602_v10 = vmin.f32 %v912_v0, 16.0  ;;  %v952_v11 = vmul.f32 %v2593_v32, %v2593_v32  ;;  %vm825_vm15 = vcmp.eq.f32.partialorder %v824_v61, 8.507059e+37 }
 0x1bc   : > { %1018 = vst [vmem:[%s2379_s0 + $0x10] sm:$0xff] %v1010_v1  ;;  %v819_v14 = vadd.f32 %v1541_v46, %v818_v3  ;;  %v844_v15 = vmul.f32 %v843_v38, %v2469_v6  ;;  %vm860_vm0 = vweird.f32 %v854_v47  ;;  %v866_v21 = vand.u32 2147483648, %v854_v47 }
 0x1bd   : > { %v1543_v16 = vpop.eup %1542  ;;  %v889_v12 = vmul.f32 %v888_v9, %v2501_v2  ;;  %v914_v18 = vmul.f32 2.1237322e-06, %v2602_v10  ;;  %v925_v19 = vmul.f32 3.8918573e-05, %v2602_v10  ;;  %v2611_v63 = vmin.f32 %v952_v11, 16.0 }
 0x1be   : > { %v823_v20 = vsel %vm2598_vm14, %v1541_v46, %v819_v14  ;;  %v856_v39 = vmul.f32 %v1543_v16, %v854_v47  ;;  %v879_v22 = vadd.f32 0.05243302, %v878_v5  ;;  %vm2615_vm1 = vcmp.eq.f32.partialorder %v864_v36, 8.507059e+37 }
 0x1bf   : > { %v828_v23 = vsel %vm825_vm15, %v827_v4, %v823_v20  ;;  %v890_v6 = vadd.f32 0.112945676, %v889_v12  ;;  %v915_v28 = vadd.f32 0.00028619796, %v914_v18  ;;  %vm861_vm2 = vweird.f32 %v1543_v16  ;;  %v644_v18 = vld [vmem:[#allocation2 + $0x8] sm:$0xff] }
 0x1c0   : > { %v829_v24 = vmul.f32 %v828_v23, %v804_v62  ;;  %v857_v25 = vsub.f32 1.0, %v856_v39  ;;  %v926_v33 = vadd.f32 0.001143296, %v925_v19  ;;  %v954_v31 = vmul.f32 2.1237322e-06, %v2611_v63  ;;  %vm2625_vm3 = vmor %vm860_vm0, %vm861_vm2 }
 0x1c1   : > { %v891_v26 = vmul.f32 %v890_v6, %v2501_v2  ;;  %v916_v59 = vmul.f32 %v915_v28, %v2602_v10  ;;  %v965_v27 = vmul.f32 3.8918573e-05, %v2611_v63  ;;  %v867_v41 = vor.u32 1.1754944e-38, %v866_v21 }
 0x1c2   : > { %v1245_v35 = vclamps-f32 %v829_v24, 1.0  ;;  %v858_v40 = vmul.f32 %v1543_v16, %v857_v25  ;;  %v927_v42 = vmul.f32 %v926_v33, %v2602_v10  ;;  %v880_v44 = vmul.f32 %v879_v22, %v2501_v2 }
 0x1c3   : > { %v892_v45 = vadd.f32 0.4994258, %v891_v26  ;;  %v917_v30 = vadd.f32 0.0036580483, %v916_v59  ;;  %v955_v46 = vadd.f32 0.00028619796, %v954_v31 }
 0x1c4   : > { %v995_v13 = vadd.f32 1.0, %v1245_v35  ;;  %v859_v48 = vadd.f32 %v1543_v16, %v858_v40  ;;  %v928_v50 = vadd.f32 0.014752088, %v927_v42  ;;  %v966_v51 = vadd.f32 0.001143296, %v965_v27 }
 0x1c5   : > { %v893_v54 = vmul.f32 %v892_v45, %v2501_v2  ;;  %v956_v55 = vmul.f32 %v955_v46, %v2611_v63  ;;  %v918_v62 = vmul.f32 %v917_v30, %v2602_v10  ;;  %v881_v3 = vadd.f32 0.18741608, %v880_v44 }
 0x1c6   : > { %v1003_v47 = vmul.f32 %v995_v13, %v2583_v37  ;;  %v863_v61 = vsel %vm2625_vm3, %v1543_v16, %v859_v48  ;;  %v929_v57 = vmul.f32 %v928_v50, %v2602_v10  ;;  %v967_v56 = vmul.f32 %v966_v51, %v2611_v63 }
 0x1c7   : > { %v868_v58 = vsel %vm2615_vm1, %v867_v41, %v863_v61  ;;  %v894_v38 = vadd.f32 1.0, %v893_v54  ;;  %v957_v5 = vadd.f32 0.0036580483, %v956_v55  ;;  %v660_v37 = vmul.f32 0.5, %v2465_v60 }
 0x1c8   : > { %v1011_v0 = vmul.f32 %v1003_v47, %v643_v52  ;;  %v869_v1 = vmul.f32 %v868_v58, %v844_v15  ;;  %v930_v4 = vadd.f32 0.112945676, %v929_v57  ;;  %v919_v9 = vadd.f32 0.05243302, %v918_v62 }
 0x1c9   : > { %1544 = vrcp.f32 %v894_v38  ;;  %v968_v11 = vadd.f32 0.014752088, %v967_v56  ;;  %v882_v16 = vmul.f32 %v881_v3, %v2501_v2  ;;  %v958_v15 = vmul.f32 %v957_v5, %v2611_v63 }
 0x1ca   : > { %1019 = vst [vmem:[%s2379_s0 + $0x18] sm:$0xff] %v1011_v0  ;;  %v1246_v8 = vclamps-f32 %v869_v1, 1.0  ;;  %v931_v36 = vmul.f32 %v930_v4, %v2602_v10  ;;  %v920_v60 = vmul.f32 %v919_v9, %v2602_v10  ;;  %v906_v28 = vand.u32 2147483648, %v894_v38 }
 0x1cb   : > { %v969_v19 = vmul.f32 %v968_v11, %v2611_v63  ;;  %v883_v29 = vadd.f32 1.1283791, %v882_v16  ;;  %v959_v2 = vadd.f32 0.05243302, %v958_v15  ;;  %vm900_vm4 = vweird.f32 %v894_v38 }
 0x1cc   : > { %v996_v14 = vadd.f32 1.0, %v1246_v8  ;;  %v932_v12 = vadd.f32 0.4994258, %v931_v36  ;;  %v904_v26 = vand.u32 2147483647, %v894_v38  ;;  %v907_v35 = vor.u32 1.1754944e-38, %v906_v28 }
 0x1cd   : > { %v970_v22 = vadd.f32 0.112945676, %v969_v19  ;;  %v921_v59 = vadd.f32 0.18741608, %v920_v60  ;;  %v960_v40 = vmul.f32 %v959_v2, %v2611_v63  ;;  %v884_v41 = vmul.f32 %v883_v29, %v2478_v17  ;;  %v647_v28 = vld [vmem:[#allocation2 + $0x38] sm:$0xff] }
 0x1ce   : > { %v1004_v20 = vmul.f32 %v996_v14, %v660_v37  ;;  %v933_v39 = vmul.f32 %v932_v12, %v2602_v10  ;;  %vm905_vm7 = vcmp.eq.f32.partialorder %v904_v26, 8.507059e+37  ;;  %v661_v52 = vmul.f32 0.5, %v2471_v7 }
 0x1cf   : > { %v1545_v21 = vpop.eup %1544  ;;  %v971_v25 = vmul.f32 %v970_v22, %v2611_v63  ;;  %v922_v44 = vmul.f32 %v921_v59, %v2602_v10  ;;  %v961_v48 = vadd.f32 0.18741608, %v960_v40  ;;  %v662_v16 = vmul.f32 0.5, %v2569_v34 }
 0x1d0   : > { %v1012_v23 = vmul.f32 %v1004_v20, %v644_v18  ;;  %v896_v6 = vmul.f32 %v1545_v21, %v894_v38  ;;  %v934_v24 = vadd.f32 1.0, %v933_v39  ;;  %vm901_vm5 = vweird.f32 %v1545_v21  ;;  %v645_v38 = vld [vmem:[#allocation2 + $0x20] sm:$0xff]  ;;  %v646_v20 = vld [vmem:[#allocation2 + $0x28] sm:$0xff] }
 0x1d1   : > { %v972_v27 = vadd.f32 0.4994258, %v971_v25  ;;  %vm902_vm6 = vmor %vm900_vm4, %vm901_vm5  ;;  %v923_v54 = vadd.f32 1.1283791, %v922_v44  ;;  %v962_v57 = vmul.f32 %v961_v48, %v2611_v63  ;;  %v663_v29 = vmul.f32 0.5, %v2579_v53 }
 0x1d2   : > { %1020 = vst [vmem:[%s2379_s0 + $0x20] sm:$0xff] %v1012_v23  ;;  %v897_v33 = vsub.f32 1.0, %v896_v6  ;;  %1546 = vrcp.f32 %v934_v24  ;;  %vm940_vm8 = vweird.f32 %v934_v24  ;;  %v946_v55 = vand.u32 2147483648, %v934_v24 }
 0x1d3   : > { %v973_v43 = vmul.f32 %v972_v27, %v2611_v63  ;;  %v944_v61 = vand.u32 2147483647, %v934_v24  ;;  %v924_v1 = vmul.f32 %v923_v54, %v2576_v49  ;;  %v963_v3 = vadd.f32 1.1283791, %v962_v57 }
 0x1d4   : > { %v898_v31 = vmul.f32 %v1545_v21, %v897_v33  ;;  %v947_v62 = vor.u32 1.1754944e-38, %v946_v55 }
 0x1d5   : > { %v974_v30 = vadd.f32 1.0, %v973_v43  ;;  %vm945_vm11 = vcmp.eq.f32.partialorder %v944_v61, 8.507059e+37  ;;  %v964_v18 = vmul.f32 %v963_v3, %v2593_v32 }
 0x1d6   : > { %v899_v42 = vadd.f32 %v1545_v21, %v898_v31 }
 0x1d7   : > { %1548 = vrcp.f32 %v974_v30  ;;  %vm980_vm12 = vweird.f32 %v974_v30  ;;  %v986_v8 = vand.u32 2147483648, %v974_v30  ;;  %v984_v9 = vand.u32 2147483647, %v974_v30 }
 0x1d8   : > { %v903_v45 = vsel %vm902_vm6, %v1545_v21, %v899_v42  ;;  %v1547_v46 = vpop.eup %1546 }
 0x1d9   : > { %v908_v13 = vsel %vm905_vm7, %v907_v35, %v903_v45  ;;  %v936_v51 = vmul.f32 %v1547_v46, %v934_v24  ;;  %vm941_vm9 = vweird.f32 %v1547_v46  ;;  %v987_v49 = vor.u32 1.1754944e-38, %v986_v8 }
 0x1da   : > { %v909_v50 = vmul.f32 %v908_v13, %v884_v41  ;;  %vm942_vm10 = vmor %vm940_vm8, %vm941_vm9  ;;  %vm985_vm15 = vcmp.eq.f32.partialorder %v984_v9, 8.507059e+37 }
 0x1db   : > { %v937_v47 = vsub.f32 1.0, %v936_v51 }
 0x1dc   : > { %v1247_v17 = vclamps-f32 %v909_v50, 1.0 }
 0x1dd   : > { %v938_v58 = vmul.f32 %v1547_v46, %v937_v47  ;;  %v1549_v56 = vpop.eup %1548 }
 0x1de   : > { %v997_v10 = vadd.f32 1.0, %v1247_v17  ;;  %v976_v4 = vmul.f32 %v1549_v56, %v974_v30  ;;  %vm981_vm13 = vweird.f32 %v1549_v56 }
 0x1df   : > { %v939_v7 = vadd.f32 %v1547_v46, %v938_v58  ;;  %vm982_vm14 = vmor %vm980_vm12, %vm981_vm13 }
 0x1e0   : > { %v1005_v0 = vmul.f32 %v997_v10, %v661_v52  ;;  %v977_v63 = vsub.f32 1.0, %v976_v4 }
 0x1e1   : > { %v943_v37 = vsel %vm942_vm10, %v1547_v46, %v939_v7 }
 0x1e2   : > { %v1013_v5 = vmul.f32 %v1005_v0, %v645_v38  ;;  %v948_v36 = vsel %vm945_vm11, %v947_v62, %v943_v37  ;;  %v978_v14 = vmul.f32 %v1549_v56, %v977_v63 }
 0x1e3   : > { %v949_v11 = vmul.f32 %v948_v36, %v924_v1 }
 0x1e4   : > { %1021 = vst [vmem:[%s2379_s0 + $0x28] sm:$0xff] %v1013_v5  ;;  %v979_v15 = vadd.f32 %v1549_v56, %v978_v14 }
 0x1e5   : > { %v1248_v12 = vclamps-f32 %v949_v11, 1.0 }
 0x1e6   : > { %v983_v39 = vsel %vm982_vm14, %v1549_v56, %v979_v15 }
 0x1e7   : > { %v998_v19 = vadd.f32 1.0, %v1248_v12  ;;  %v988_v60 = vsel %vm985_vm15, %v987_v49, %v983_v39 }
 0x1e8   : > { %v989_v22 = vmul.f32 %v988_v60, %v964_v18 }
 0x1e9   : > { %v1006_v21 = vmul.f32 %v998_v19, %v662_v16 }
 0x1ea   : > { %v1249_v6 = vclamps-f32 %v989_v22, 1.0 }
 0x1eb   : > { %v1014_v23 = vmul.f32 %v1006_v21, %v646_v20 }
 0x1ec   : > { %v999_v34 = vadd.f32 1.0, %v1249_v6 }
 0x1ed   : > { %1022 = vst [vmem:[%s2379_s0 + $0x30] sm:$0xff] %v1014_v23 }
 0x1ee   : > { %v1007_v24 = vmul.f32 %v999_v34, %v663_v29 }
 0x1f0   : > { %v1015_v2 = vmul.f32 %v1007_v24, %v647_v28 }
 0x1f2   : > { %1023 = vst [vmem:[%s2379_s0 + $0x38] sm:$0xff] %v1015_v2 }
 0x1f3 PF: > { %s2908_s27 = sld [smem:[#allocation35_spill]]  ;;  %s1039_s26 = sshll.u32 %s2379_s0, 4  ;;  %s1040_s26 = int_to_ptr.vmem [resolvable:$true] %s1039_s26 }
 0x1f4   : > { %s2909_s20 = sld [smem:[#allocation34_spill]]  ;;  %s1025_s24 = scalar_lea.sflag [#allocation6], %s429_s2 }
 0x1f5   : > { %s2912_s3 = sld [smem:[#allocation53_spill]] }
 0x1f9   : > { %s1258_s8 = sshll.u32 %s2908_s27, 4 }
 0x1fa   : > { %s1036_s12 = sadd.s32 %s2909_s20, %s1258_s8 }
 0x1fb   : > { %s1253_s1 = sshll.u32 %s1036_s12, 3  ;;  %s1720_s29 = scalar_lea.hbm %s2912_s3, 256 }
 0x1fc   : > { %s1038_s5 = scalar_lea.hbm %s2912_s3, %s1253_s1 }
 0x1fd   : > { %s1041_s18 = sshll.u32 %s1038_s5, 4  ;;  %s1042_s18 = int_to_ptr.hbm [resolvable:$true] %s1041_s18 }
 0x1fe   : > { %s1714_s30 = sshra.s32 %s1042_s18, 4  ;;  %s1715_s30 = int_to_ptr.hbm [resolvable:$true] %s1714_s30 }
 0x1ff   : > { %s1716_s22 = scalar_lea.hbm %s1715_s30, 64  ;;  %p1721_p13 = scmp.lt.s32.totalorder %s1715_s30, %s2912_s3 }
 0x200   : > { %p1717_p11 = scmp.ne.s32.totalorder %s1715_s30, %s1716_s22  ;;  %p1722_p12 = scmp.lt.s32.totalorder %s1720_s29, %s1716_s22 }
 0x202   : > { %p1718_p5 = pnand %p1717_p11, %p2264_p7  ;;  %p1723_p10 = por %p1722_p12, %p1721_p13 }
 0x204   : > { %p1719_p0 = pneg %p1718_p5 }
 0x206   : > { %p1724_p4 = pnand %p1723_p10, %p1719_p0 }
 0x208   : > { %1727 = shalt.err (!%p1724_p4)
}
 0x209   : > { %s1956_s2 = smov 128   ;;  %s1957_s7 = smov 256  }
 0x20a   : > { %s1958_s4 = smov 8  }
 0x20b   : > { %1301 = dma.vmem_to_hbm [thread:$0]  (%p2264_p7), %s1040_s26, 1024, %s1042_s18, %s1025_s24, %s1956_s2, %s1957_s7, %s1958_s4  }
 0x20c PF: > { %s2913_s27 = sld [smem:[#allocation20_spill]]  ;;  %p1324_p1 = scmp.ge.s32.totalorder %s1950_s17, 2 }
 0x20d   : > { %s2914_s20 = sld [smem:[#allocation47_spill]] }
 0x212   : > { %s1056_s23 = sand.u32 1, %s2913_s27  }
 0x213   : > { %p2915_p3 = scmp.ne.s32.totalorder %s2914_s20, 0  ;;  %s1057_s8 = scalar_lea.sflag [#allocation6], %s1056_s23 }
 0x215   : > { %p1320_p8 = pnand %p1324_p1, %p2915_p3 }
 0x217   : > { %p1321_p9 = pneg %p1320_p8 }
 0x219   : > { %1849 = dma.done.wait (%p1321_p9), %s1057_s8, 1024  }
 0x21a   : > { %1851 = vsyncadd (%p1321_p9), %s1057_s8, 4294966272  ;;  %s27_s17 = sadd.s32 1, %s1950_s17   ;;  %s2918_s18 = sld [smem:[#allocation22_spill]] }
 0x21b   : > { %p2686_p2 = scmp.ge.s32.totalorder %s27_s17, 10   ;;  %s2919_s19 = sld [smem:[#allocation23_spill]] }
 0x21c   : > { %s2920_s20 = sld [smem:[#allocation46_spill]]  ;;  %s2927_s16 = smov %s2965_s28 }
 0x21d   : > { %s2916_s12 = scalar_select %p2686_p2, 1, 0 }
 0x21e   : > { %s2921_s21 = sld [smem:[#allocation21_spill]]  ;;  %s2935_s23 = smov %s2319_s11 }
 0x21f   : > { %2917 = sst [smem:[#allocation20_spill]] %s2916_s12  ;;  %s2937_s24 = smov %s1882_s25 }
 0x220   : > { %s2922_s22 = sld [smem:[#allocation25_spill]]  ;;  %s2938_s3 = smov %s2200_s13 }
 0x221   : > { %s2923_s26 = sld [smem:[#allocation26_spill]]  ;;  %s2944_s29 = smov %s2927_s16 }
 0x222   : > { %s2924_s1 = sld [smem:[#allocation41_spill]] }
 0x223   : > { %s2925_s27 = sld [smem:[#allocation28_spill]] }
 0x224   : > { %s2926_s10 = sld [smem:[#allocation29_spill]] }
 0x225   : > { %s2928_s30 = sld [smem:[#allocation30_spill]] }
 0x226   : > { %s2929_s6 = sld [smem:[#allocation31_spill]] }
 0x227   : > { %s2930_s7 = sld [smem:[#allocation42_spill]]  ;;  %s2939_s25 = smov %s2923_s26 }
 0x228   : > { %s2931_s5 = sld [smem:[#allocation32_spill]]  ;;  %s2941_s26 = smov %s2924_s1 }
 0x229   : > { %s2932_s14 = sld [smem:[#allocation45_spill]] }
 0x22a   : > { %s2933_s0 = sld [smem:[#allocation36_spill]]  ;;  %s2943_s28 = smov %s2926_s10 }
 0x22b   : > { %s2934_s2 = sld [smem:[#allocation37_spill]] }
 0x22c   : > { %s2936_s4 = sld [smem:[#allocation38_spill]] }
 0x22d   : > { %s2940_s12 = sld [smem:[#allocation43_spill]] }
 0x22e   : > { %2945 = sst [smem:[#allocation20_spill]] %s1918_s9  ;;  %s2946_s9 = smov %s2931_s5 }
 0x22f   : > { %s2947_s10 = smov %s2932_s14  ;;  %2949 = sst [smem:[#allocation21_spill]] %s1942_s15 }
 0x230   : > { %s2948_s11 = smov %s2933_s0  ;;  %s2952_s15 = smov %s2938_s3 }
 0x231   : > { %s2950_s13 = smov %s2934_s2  ;;  %26 = sbr.rel (!%p2686_p2) target bundleno = 28 (0x1c), region = 141 }
 0x232   : > { %s2951_s14 = smov %s2936_s4 }
 0x233   : > { %s2953_s16 = smov %s2940_s12 }
 0x236   :  { %1063 = vsyncpa [#allocation5], 1 }
 0x237   :  { %1065 = vsyncpa [#allocation5 + $0x1], 1 }
 0x238   :  { %1066 = vsyncpa [#allocation8], 1 }
 0x239   :  { %1068 = vsyncpa [#allocation8 + $0x1], 1 }
 0x23a   :  { %1069 = vsyncpa [#allocation11], 1 }
 0x23b   :  { %1071 = vsyncpa [#allocation11 + $0x1], 1 }
 0x23c   :  { %1072 = vsyncpa [#allocation6], 1 }
 0x23d   :  { %1074 = vsyncpa [#allocation6 + $0x1], 1 }

</bundles_post_ra>
